<compile_context>
chip_gen: v7x
topology: tpu7x:2x2x1
jax: 0.10.0
libtpu: 0.0.40
codegen_flags: <defaults>
</compile_context>

<pallas_src>
import functools
import math

import jax
import jax.numpy as jnp
from jax.experimental import pallas as pl
from jax.experimental.pallas import tpu as pltpu


# ----------------------------------------------------------------------------
# Fused forward kernel
# ----------------------------------------------------------------------------

def _layernorm(x, gamma, beta):
    """PyTorch LayerNorm: biased variance, eps=1e-5."""
    mu = jnp.mean(x, axis=-1, keepdims=True)
    var = jnp.mean(jnp.square(x - mu), axis=-1, keepdims=True)
    return (x - mu) * jax.lax.rsqrt(var + 1e-5) * gamma + beta


def _build_forward_kernel(num_tf_layers, lstm_layer_counts):
    """Builds the fused kernel body for a given static layer structure."""

    def kernel(*refs):
        out_ref, lstm3_ref = refs[-2], refs[-1]
        it = iter(refs[:-2])

        x_ref = next(it)
        pe0_ref = next(it)

        # Positional encoding (seq dim is 1 -> only pe[0] is added).
        h = x_ref[...] + pe0_ref[...]

        # Transformer encoder layers (post-norm, ReLU FFN).  Softmax over a
        # single key is exactly 1, so attention reduces to the pre-folded
        # w_attn / b_attn projection.
        for _ in range(num_tf_layers):
            w_attn = next(it); b_attn = next(it)
            w1 = next(it); b1 = next(it)
            w2 = next(it); b2 = next(it)
            ln1_g = next(it); ln1_b = next(it)
            ln2_g = next(it); ln2_b = next(it)

            attn = jnp.dot(h, w_attn[...],
                           preferred_element_type=jnp.float32) + b_attn[...]
            h = _layernorm(h + attn, ln1_g[...], ln1_b[...])

            # FFN in bf16 (weights stored bf16), f32 accumulation.
            ff = jnp.dot(h.astype(w1.dtype), w1[...],
                         preferred_element_type=jnp.float32) + b1[...]
            ff = jnp.maximum(ff, 0.0)
            ff = jnp.dot(ff.astype(w2.dtype), w2[...],
                         preferred_element_type=jnp.float32) + b2[...]
            h = _layernorm(h + ff, ln2_g[...], ln2_b[...])

        # Three stacked bidirectional LSTMs, seq_len == 1, (h0, c0) == 0.
        # Forget gate multiplies c0 == 0 (inert); reverse dir == forward step.
        # Fused weight columns: [i_f | i_b | g_f | g_b | o_f | o_b], so the
        # elementwise gate math emits [h_f | h_b] = the (N, 2H) output.
        for n_layers in lstm_layer_counts:
            for _ in range(n_layers):
                w = next(it); b = next(it)
                z = jnp.dot(h, w[...],
                            preferred_element_type=jnp.float32) + b[...]
                two_h = z.shape[1] // 3
                i = jax.nn.sigmoid(z[:, :two_h])
                g = jnp.tanh(z[:, two_h:2 * two_h])
                o = jax.nn.sigmoid(z[:, 2 * two_h:])
                h = o * jnp.tanh(i * g)          # (N, 2H) bidirectional output

        lstm3_ref[...] = h                       # (N, 2*H3)

        fc_w = next(it); fc_b = next(it)
        out_ref[...] = jnp.dot(h, fc_w[...],
                               preferred_element_type=jnp.float32) + fc_b[...]

    return kernel


def _flatten_params(params):
    """Flatten params into the exact order the kernel consumes them."""
    flat = [params["pe0"]]
    for layer in params["transformer"]:
        flat += [layer["w_attn"], layer["b_attn"],
                 layer["w1"], layer["b1"], layer["w2"], layer["b2"],
                 layer["ln1_g"], layer["ln1_b"], layer["ln2_g"], layer["ln2_b"]]
    for stack in (params["lstm1"], params["lstm2"], params["lstm3"]):
        for layer in stack:
            flat += [layer["w"], layer["b"]]
    flat += [params["fc_w"], params["fc_b"]]
    return flat


def forward(x, params):
    n = x.shape[0]
    output_dim = params["fc_w"].shape[1]
    two_h3 = params["lstm3"][-1]["w"].shape[1] // 3

    flat = _flatten_params(params)
    kernel = _build_forward_kernel(
        num_tf_layers=len(params["transformer"]),
        lstm_layer_counts=(len(params["lstm1"]),
                           len(params["lstm2"]),
                           len(params["lstm3"])),
    )

    vmem = pl.BlockSpec(memory_space=pltpu.MemorySpace.VMEM)
    out, out_lstm3 = pl.pallas_call(
        kernel,
        out_shape=(jax.ShapeDtypeStruct((n, output_dim), jnp.float32),
                   jax.ShapeDtypeStruct((n, two_h3), jnp.float32)),
        in_specs=[vmem] * (1 + len(flat)),
        out_specs=(vmem, vmem),
    )(x, *flat)

    # PyTorch returns (fc(out_lstm3).squeeze(1), out_lstm3) with seq dim of 1.
    return out, out_lstm3[:, None, :]


# ----------------------------------------------------------------------------
# Deterministic parameter construction (fused / pre-folded layouts)
# ----------------------------------------------------------------------------

def init_params(key, input_size, nhead, lstm_input_size, num_layers,
                h1, h2, h3, layer_dim, output_dim, dim_feedforward=2048,
                max_len=21):
    del nhead  # head split is irrelevant for a length-1 sequence
    keys = iter(jax.random.split(key, 4096))

    def nrm(shape, scale=0.1):
        return (scale * jax.random.normal(next(keys), shape)).astype(jnp.float32)

    # PositionalEncoding buffer (faithful construction; only row 0 is used).
    pe = jnp.zeros((max_len, input_size), jnp.float32)
    position = jnp.arange(0, max_len, dtype=jnp.float32)[:, None]
    div_term = jnp.exp(jnp.arange(0, input_size, 2, dtype=jnp.float32)
                       * (-math.log(10000.0) / input_size))
    pe = pe.at[:, 0::2].set(jnp.sin(position * div_term))
    if input_size % 2 == 0:
        pe = pe.at[:, 1::2].set(jnp.cos(position * div_term))
    else:
        pe = pe.at[:, 1::2].set(jnp.cos(position * div_term[:-1]))

    transformer = []
    for _ in range(num_layers):
        wv_t = nrm((input_size, input_size)); bv = nrm((input_size,))
        wo_t = nrm((input_size, input_size)); bo = nrm((input_size,))
        # seq_len == 1  =>  attention == out_proj(V_proj(x)); fold both
        # projections into one weight/bias at construction time.
        w_attn = wv_t @ wo_t
        b_attn = bv @ wo_t + bo
        transformer.append(dict(
            w_attn=w_attn,
            b_attn=b_attn.reshape(1, input_size),
            w1=nrm((input_size, dim_feedforward)).astype(jnp.bfloat16),
            b1=nrm((dim_feedforward,)).reshape(1, dim_feedforward),
            w2=nrm((dim_feedforward, input_size)).astype(jnp.bfloat16),
            b2=nrm((input_size,)).reshape(1, input_size),
            ln1_g=jnp.ones((1, input_size), jnp.float32),
            ln1_b=jnp.zeros((1, input_size), jnp.float32),
            ln2_g=jnp.ones((1, input_size), jnp.float32),
            ln2_b=jnp.zeros((1, input_size), jnp.float32),
        ))

    def lstm_layer(in_dim, hid):
        # Fused bidirectional gate weight: columns [i_f|i_b|g_f|g_b|o_f|o_b],
        # each (in_dim, hid); biases carry b_ih + b_hh per gate.  The forget
        # gate is dropped (inert: c0 == 0, seq_len == 1).
        cols = [nrm((in_dim, hid)) for _ in range(6)]
        bias = [nrm((hid,)) for _ in range(6)]
        return dict(w=jnp.concatenate(cols, axis=1),
                    b=jnp.concatenate(bias).reshape(1, 6 * hid))

    def make_lstm(in_dim, hid):
        layers, d = [], in_dim
        for _ in range(layer_dim):
            layers.append(lstm_layer(d, hid))
            d = 2 * hid  # bidirectional output feeds the next layer
        return layers

    return dict(
        pe0=pe[0].reshape(1, input_size),
        transformer=transformer,
        lstm1=make_lstm(lstm_input_size, h1),
        lstm2=make_lstm(2 * h1, h2),
        lstm3=make_lstm(2 * h2, h3),
        fc_w=nrm((2 * h3, output_dim)),
        fc_b=nrm((output_dim,)).reshape(1, output_dim),
    )


# ----------------------------------------------------------------------------
# Demo
# ----------------------------------------------------------------------------

if __name__ == "__main__":
    key = jax.random.PRNGKey(0)
    k_params, k_x = jax.random.split(key)

    N = 8                 # number of samples (== "batch" seen by the LSTMs)
    input_size = 16       # d_model == lstm_input_size
    nhead = 4
    lstm_input_size = input_size
    num_layers = 2        # transformer encoder layers
    H1, H2, H3 = 32, 24, 16
    layer_dim = 1
    output_dim = 1

    # TODO(synk): nn.Dropout (p=0.5 after lstm1, p=0.1 inside the transformer)
    # is treated as identity (eval-mode / deterministic forward semantics).
    params = init_params(k_params, input_size, nhead, lstm_input_size,
                         num_layers, H1, H2, H3, layer_dim, output_dim)
    x = jax.random.normal(k_x, (N, input_size), dtype=jnp.float32)

    fwd = jax.jit(forward)
    out, out_lstm3 = fwd(x, params)
    jax.block_until_ready((out, out_lstm3))

    assert out.shape == (N, output_dim)
    assert out_lstm3.shape == (N, 1, 2 * H3)
    assert jnp.all(jnp.isfinite(out)) and jnp.all(jnp.isfinite(out_lstm3))
    print("KERNEL_OK")
</pallas_src>

<mosaic_0001>
module attributes {stable_mosaic.version = 11 : i64} {
  func.func @kernel(%arg0: memref<8x16xf32, #tpu.memory_space<vmem>>, %arg1: memref<1x16xf32, #tpu.memory_space<vmem>>, %arg2: memref<16x16xf32, #tpu.memory_space<vmem>>, %arg3: memref<1x16xf32, #tpu.memory_space<vmem>>, %arg4: memref<16x2048xbf16, #tpu.memory_space<vmem>>, %arg5: memref<1x2048xf32, #tpu.memory_space<vmem>>, %arg6: memref<2048x16xbf16, #tpu.memory_space<vmem>>, %arg7: memref<1x16xf32, #tpu.memory_space<vmem>>, %arg8: memref<1x16xf32, #tpu.memory_space<vmem>>, %arg9: memref<1x16xf32, #tpu.memory_space<vmem>>, %arg10: memref<1x16xf32, #tpu.memory_space<vmem>>, %arg11: memref<1x16xf32, #tpu.memory_space<vmem>>, %arg12: memref<16x16xf32, #tpu.memory_space<vmem>>, %arg13: memref<1x16xf32, #tpu.memory_space<vmem>>, %arg14: memref<16x2048xbf16, #tpu.memory_space<vmem>>, %arg15: memref<1x2048xf32, #tpu.memory_space<vmem>>, %arg16: memref<2048x16xbf16, #tpu.memory_space<vmem>>, %arg17: memref<1x16xf32, #tpu.memory_space<vmem>>, %arg18: memref<1x16xf32, #tpu.memory_space<vmem>>, %arg19: memref<1x16xf32, #tpu.memory_space<vmem>>, %arg20: memref<1x16xf32, #tpu.memory_space<vmem>>, %arg21: memref<1x16xf32, #tpu.memory_space<vmem>>, %arg22: memref<16x192xf32, #tpu.memory_space<vmem>>, %arg23: memref<1x192xf32, #tpu.memory_space<vmem>>, %arg24: memref<64x144xf32, #tpu.memory_space<vmem>>, %arg25: memref<1x144xf32, #tpu.memory_space<vmem>>, %arg26: memref<48x96xf32, #tpu.memory_space<vmem>>, %arg27: memref<1x96xf32, #tpu.memory_space<vmem>>, %arg28: memref<32x1xf32, #tpu.memory_space<vmem>>, %arg29: memref<1x1xf32, #tpu.memory_space<vmem>>, %arg30: memref<8x1xf32, #tpu.memory_space<vmem>>, %arg31: memref<8x32xf32, #tpu.memory_space<vmem>>) attributes {dimension_semantics = [], scalar_prefetch = 0 : i64, scratch_operands = 0 : i64, tpu.core_type = #tpu.core_type<tc>} {
    %c0 = arith.constant 0 : index
    %c0_0 = arith.constant 0 : index
    %0 = vector.load %arg0[%c0, %c0_0] : memref<8x16xf32, #tpu.memory_space<vmem>>, vector<8x16xf32>
    %c0_1 = arith.constant 0 : index
    %c0_2 = arith.constant 0 : index
    %1 = vector.load %arg1[%c0_1, %c0_2] : memref<1x16xf32, #tpu.memory_space<vmem>>, vector<1x16xf32>
    %2 = vector.broadcast %1 : vector<1x16xf32> to vector<8x16xf32>
    %3 = arith.addf %0, %2 : vector<8x16xf32>
    %c0_3 = arith.constant 0 : index
    %c0_4 = arith.constant 0 : index
    %4 = vector.load %arg2[%c0_3, %c0_4] : memref<16x16xf32, #tpu.memory_space<vmem>>, vector<16x16xf32>
    %cst = arith.constant dense<0.000000e+00> : vector<8x16xf32>
    %5 = tpu.matmul %3, %4, %cst {dimension_numbers = #tpu.dot_dimension_numbers<[1], [0], [0], [1], [0, 0, 1, 1], [], []>} : vector<8x16xf32>, vector<16x16xf32>, vector<8x16xf32> -> vector<8x16xf32>
    %c0_5 = arith.constant 0 : index
    %c0_6 = arith.constant 0 : index
    %6 = vector.load %arg3[%c0_5, %c0_6] : memref<1x16xf32, #tpu.memory_space<vmem>>, vector<1x16xf32>
    %7 = vector.broadcast %6 : vector<1x16xf32> to vector<8x16xf32>
    %8 = arith.addf %5, %7 : vector<8x16xf32>
    %9 = arith.addf %3, %8 : vector<8x16xf32>
    %c0_7 = arith.constant 0 : index
    %c0_8 = arith.constant 0 : index
    %10 = vector.load %arg8[%c0_7, %c0_8] : memref<1x16xf32, #tpu.memory_space<vmem>>, vector<1x16xf32>
    %c0_9 = arith.constant 0 : index
    %c0_10 = arith.constant 0 : index
    %11 = vector.load %arg9[%c0_9, %c0_10] : memref<1x16xf32, #tpu.memory_space<vmem>>, vector<1x16xf32>
    %cst_11 = arith.constant dense<0.000000e+00> : vector<8xf32>
    %12 = vector.multi_reduction <add>, %9, %cst_11 [1] : vector<8x16xf32> to vector<8xf32>
    %13 = vector.shape_cast %12 : vector<8xf32> to vector<8x1xf32>
    %cst_12 = arith.constant 1.600000e+01 : f32
    %14 = vector.broadcast %cst_12 : f32 to vector<8x1xf32>
    %15 = arith.divf %13, %14 : vector<8x1xf32>
    %16 = vector.broadcast %15 : vector<8x1xf32> to vector<8x16xf32>
    %17 = arith.subf %9, %16 : vector<8x16xf32>
    %18 = arith.mulf %17, %17 : vector<8x16xf32>
    %cst_13 = arith.constant dense<0.000000e+00> : vector<8xf32>
    %19 = vector.multi_reduction <add>, %18, %cst_13 [1] : vector<8x16xf32> to vector<8xf32>
    %20 = vector.shape_cast %19 : vector<8xf32> to vector<8x1xf32>
    %cst_14 = arith.constant 1.600000e+01 : f32
    %21 = vector.broadcast %cst_14 : f32 to vector<8x1xf32>
    %22 = arith.divf %20, %21 : vector<8x1xf32>
    %23 = vector.broadcast %15 : vector<8x1xf32> to vector<8x16xf32>
    %24 = arith.subf %9, %23 : vector<8x16xf32>
    %cst_15 = arith.constant 9.99999974E-6 : f32
    %25 = vector.broadcast %cst_15 : f32 to vector<8x1xf32>
    %26 = arith.addf %22, %25 : vector<8x1xf32>
    %27 = math.rsqrt %26 : vector<8x1xf32>
    %28 = vector.broadcast %27 : vector<8x1xf32> to vector<8x16xf32>
    %29 = arith.mulf %24, %28 : vector<8x16xf32>
    %30 = vector.broadcast %10 : vector<1x16xf32> to vector<8x16xf32>
    %31 = arith.mulf %29, %30 : vector<8x16xf32>
    %32 = vector.broadcast %11 : vector<1x16xf32> to vector<8x16xf32>
    %33 = arith.addf %31, %32 : vector<8x16xf32>
    %34 = arith.truncf %33 : vector<8x16xf32> to vector<8x16xbf16>
    %c0_16 = arith.constant 0 : index
    %c0_17 = arith.constant 0 : index
    %35 = vector.load %arg4[%c0_16, %c0_17] : memref<16x2048xbf16, #tpu.memory_space<vmem>>, vector<16x2048xbf16>
    %cst_18 = arith.constant dense<0.000000e+00> : vector<8x2048xf32>
    %36 = tpu.matmul %34, %35, %cst_18 {dimension_numbers = #tpu.dot_dimension_numbers<[1], [0], [0], [1], [0, 0, 1, 1], [], []>} : vector<8x16xbf16>, vector<16x2048xbf16>, vector<8x2048xf32> -> vector<8x2048xf32>
    %c0_19 = arith.constant 0 : index
    %c0_20 = arith.constant 0 : index
    %37 = vector.load %arg5[%c0_19, %c0_20] : memref<1x2048xf32, #tpu.memory_space<vmem>>, vector<1x2048xf32>
    %38 = vector.broadcast %37 : vector<1x2048xf32> to vector<8x2048xf32>
    %39 = arith.addf %36, %38 : vector<8x2048xf32>
    %cst_21 = arith.constant 0.000000e+00 : f32
    %40 = vector.broadcast %cst_21 : f32 to vector<8x2048xf32>
    %41 = arith.maximumf %39, %40 : vector<8x2048xf32>
    %42 = arith.truncf %41 : vector<8x2048xf32> to vector<8x2048xbf16>
    %c0_22 = arith.constant 0 : index
    %c0_23 = arith.constant 0 : index
    %43 = vector.load %arg6[%c0_22, %c0_23] : memref<2048x16xbf16, #tpu.memory_space<vmem>>, vector<2048x16xbf16>
    %cst_24 = arith.constant dense<0.000000e+00> : vector<8x16xf32>
    %44 = tpu.matmul %42, %43, %cst_24 {dimension_numbers = #tpu.dot_dimension_numbers<[1], [0], [0], [1], [0, 0, 1, 1], [], []>} : vector<8x2048xbf16>, vector<2048x16xbf16>, vector<8x16xf32> -> vector<8x16xf32>
    %c0_25 = arith.constant 0 : index
    %c0_26 = arith.constant 0 : index
    %45 = vector.load %arg7[%c0_25, %c0_26] : memref<1x16xf32, #tpu.memory_space<vmem>>, vector<1x16xf32>
    %46 = vector.broadcast %45 : vector<1x16xf32> to vector<8x16xf32>
    %47 = arith.addf %44, %46 : vector<8x16xf32>
    %48 = arith.addf %33, %47 : vector<8x16xf32>
    %c0_27 = arith.constant 0 : index
    %c0_28 = arith.constant 0 : index
    %49 = vector.load %arg10[%c0_27, %c0_28] : memref<1x16xf32, #tpu.memory_space<vmem>>, vector<1x16xf32>
    %c0_29 = arith.constant 0 : index
    %c0_30 = arith.constant 0 : index
    %50 = vector.load %arg11[%c0_29, %c0_30] : memref<1x16xf32, #tpu.memory_space<vmem>>, vector<1x16xf32>
    %cst_31 = arith.constant dense<0.000000e+00> : vector<8xf32>
    %51 = vector.multi_reduction <add>, %48, %cst_31 [1] : vector<8x16xf32> to vector<8xf32>
    %52 = vector.shape_cast %51 : vector<8xf32> to vector<8x1xf32>
    %cst_32 = arith.constant 1.600000e+01 : f32
    %53 = vector.broadcast %cst_32 : f32 to vector<8x1xf32>
    %54 = arith.divf %52, %53 : vector<8x1xf32>
    %55 = vector.broadcast %54 : vector<8x1xf32> to vector<8x16xf32>
    %56 = arith.subf %48, %55 : vector<8x16xf32>
    %57 = arith.mulf %56, %56 : vector<8x16xf32>
    %cst_33 = arith.constant dense<0.000000e+00> : vector<8xf32>
    %58 = vector.multi_reduction <add>, %57, %cst_33 [1] : vector<8x16xf32> to vector<8xf32>
    %59 = vector.shape_cast %58 : vector<8xf32> to vector<8x1xf32>
    %cst_34 = arith.constant 1.600000e+01 : f32
    %60 = vector.broadcast %cst_34 : f32 to vector<8x1xf32>
    %61 = arith.divf %59, %60 : vector<8x1xf32>
    %62 = vector.broadcast %54 : vector<8x1xf32> to vector<8x16xf32>
    %63 = arith.subf %48, %62 : vector<8x16xf32>
    %cst_35 = arith.constant 9.99999974E-6 : f32
    %64 = vector.broadcast %cst_35 : f32 to vector<8x1xf32>
    %65 = arith.addf %61, %64 : vector<8x1xf32>
    %66 = math.rsqrt %65 : vector<8x1xf32>
    %67 = vector.broadcast %66 : vector<8x1xf32> to vector<8x16xf32>
    %68 = arith.mulf %63, %67 : vector<8x16xf32>
    %69 = vector.broadcast %49 : vector<1x16xf32> to vector<8x16xf32>
    %70 = arith.mulf %68, %69 : vector<8x16xf32>
    %71 = vector.broadcast %50 : vector<1x16xf32> to vector<8x16xf32>
    %72 = arith.addf %70, %71 : vector<8x16xf32>
    %c0_36 = arith.constant 0 : index
    %c0_37 = arith.constant 0 : index
    %73 = vector.load %arg12[%c0_36, %c0_37] : memref<16x16xf32, #tpu.memory_space<vmem>>, vector<16x16xf32>
    %cst_38 = arith.constant dense<0.000000e+00> : vector<8x16xf32>
    %74 = tpu.matmul %72, %73, %cst_38 {dimension_numbers = #tpu.dot_dimension_numbers<[1], [0], [0], [1], [0, 0, 1, 1], [], []>} : vector<8x16xf32>, vector<16x16xf32>, vector<8x16xf32> -> vector<8x16xf32>
    %c0_39 = arith.constant 0 : index
    %c0_40 = arith.constant 0 : index
    %75 = vector.load %arg13[%c0_39, %c0_40] : memref<1x16xf32, #tpu.memory_space<vmem>>, vector<1x16xf32>
    %76 = vector.broadcast %75 : vector<1x16xf32> to vector<8x16xf32>
    %77 = arith.addf %74, %76 : vector<8x16xf32>
    %78 = arith.addf %72, %77 : vector<8x16xf32>
    %c0_41 = arith.constant 0 : index
    %c0_42 = arith.constant 0 : index
    %79 = vector.load %arg18[%c0_41, %c0_42] : memref<1x16xf32, #tpu.memory_space<vmem>>, vector<1x16xf32>
    %c0_43 = arith.constant 0 : index
    %c0_44 = arith.constant 0 : index
    %80 = vector.load %arg19[%c0_43, %c0_44] : memref<1x16xf32, #tpu.memory_space<vmem>>, vector<1x16xf32>
    %cst_45 = arith.constant dense<0.000000e+00> : vector<8xf32>
    %81 = vector.multi_reduction <add>, %78, %cst_45 [1] : vector<8x16xf32> to vector<8xf32>
    %82 = vector.shape_cast %81 : vector<8xf32> to vector<8x1xf32>
    %cst_46 = arith.constant 1.600000e+01 : f32
    %83 = vector.broadcast %cst_46 : f32 to vector<8x1xf32>
    %84 = arith.divf %82, %83 : vector<8x1xf32>
    %85 = vector.broadcast %84 : vector<8x1xf32> to vector<8x16xf32>
    %86 = arith.subf %78, %85 : vector<8x16xf32>
    %87 = arith.mulf %86, %86 : vector<8x16xf32>
    %cst_47 = arith.constant dense<0.000000e+00> : vector<8xf32>
    %88 = vector.multi_reduction <add>, %87, %cst_47 [1] : vector<8x16xf32> to vector<8xf32>
    %89 = vector.shape_cast %88 : vector<8xf32> to vector<8x1xf32>
    %cst_48 = arith.constant 1.600000e+01 : f32
    %90 = vector.broadcast %cst_48 : f32 to vector<8x1xf32>
    %91 = arith.divf %89, %90 : vector<8x1xf32>
    %92 = vector.broadcast %84 : vector<8x1xf32> to vector<8x16xf32>
    %93 = arith.subf %78, %92 : vector<8x16xf32>
    %cst_49 = arith.constant 9.99999974E-6 : f32
    %94 = vector.broadcast %cst_49 : f32 to vector<8x1xf32>
    %95 = arith.addf %91, %94 : vector<8x1xf32>
    %96 = math.rsqrt %95 : vector<8x1xf32>
    %97 = vector.broadcast %96 : vector<8x1xf32> to vector<8x16xf32>
    %98 = arith.mulf %93, %97 : vector<8x16xf32>
    %99 = vector.broadcast %79 : vector<1x16xf32> to vector<8x16xf32>
    %100 = arith.mulf %98, %99 : vector<8x16xf32>
    %101 = vector.broadcast %80 : vector<1x16xf32> to vector<8x16xf32>
    %102 = arith.addf %100, %101 : vector<8x16xf32>
    %103 = arith.truncf %102 : vector<8x16xf32> to vector<8x16xbf16>
    %c0_50 = arith.constant 0 : index
    %c0_51 = arith.constant 0 : index
    %104 = vector.load %arg14[%c0_50, %c0_51] : memref<16x2048xbf16, #tpu.memory_space<vmem>>, vector<16x2048xbf16>
    %cst_52 = arith.constant dense<0.000000e+00> : vector<8x2048xf32>
    %105 = tpu.matmul %103, %104, %cst_52 {dimension_numbers = #tpu.dot_dimension_numbers<[1], [0], [0], [1], [0, 0, 1, 1], [], []>} : vector<8x16xbf16>, vector<16x2048xbf16>, vector<8x2048xf32> -> vector<8x2048xf32>
    %c0_53 = arith.constant 0 : index
    %c0_54 = arith.constant 0 : index
    %106 = vector.load %arg15[%c0_53, %c0_54] : memref<1x2048xf32, #tpu.memory_space<vmem>>, vector<1x2048xf32>
    %107 = vector.broadcast %106 : vector<1x2048xf32> to vector<8x2048xf32>
    %108 = arith.addf %105, %107 : vector<8x2048xf32>
    %cst_55 = arith.constant 0.000000e+00 : f32
    %109 = vector.broadcast %cst_55 : f32 to vector<8x2048xf32>
    %110 = arith.maximumf %108, %109 : vector<8x2048xf32>
    %111 = arith.truncf %110 : vector<8x2048xf32> to vector<8x2048xbf16>
    %c0_56 = arith.constant 0 : index
    %c0_57 = arith.constant 0 : index
    %112 = vector.load %arg16[%c0_56, %c0_57] : memref<2048x16xbf16, #tpu.memory_space<vmem>>, vector<2048x16xbf16>
    %cst_58 = arith.constant dense<0.000000e+00> : vector<8x16xf32>
    %113 = tpu.matmul %111, %112, %cst_58 {dimension_numbers = #tpu.dot_dimension_numbers<[1], [0], [0], [1], [0, 0, 1, 1], [], []>} : vector<8x2048xbf16>, vector<2048x16xbf16>, vector<8x16xf32> -> vector<8x16xf32>
    %c0_59 = arith.constant 0 : index
    %c0_60 = arith.constant 0 : index
    %114 = vector.load %arg17[%c0_59, %c0_60] : memref<1x16xf32, #tpu.memory_space<vmem>>, vector<1x16xf32>
    %115 = vector.broadcast %114 : vector<1x16xf32> to vector<8x16xf32>
    %116 = arith.addf %113, %115 : vector<8x16xf32>
    %117 = arith.addf %102, %116 : vector<8x16xf32>
    %c0_61 = arith.constant 0 : index
    %c0_62 = arith.constant 0 : index
    %118 = vector.load %arg20[%c0_61, %c0_62] : memref<1x16xf32, #tpu.memory_space<vmem>>, vector<1x16xf32>
    %c0_63 = arith.constant 0 : index
    %c0_64 = arith.constant 0 : index
    %119 = vector.load %arg21[%c0_63, %c0_64] : memref<1x16xf32, #tpu.memory_space<vmem>>, vector<1x16xf32>
    %cst_65 = arith.constant dense<0.000000e+00> : vector<8xf32>
    %120 = vector.multi_reduction <add>, %117, %cst_65 [1] : vector<8x16xf32> to vector<8xf32>
    %121 = vector.shape_cast %120 : vector<8xf32> to vector<8x1xf32>
    %cst_66 = arith.constant 1.600000e+01 : f32
    %122 = vector.broadcast %cst_66 : f32 to vector<8x1xf32>
    %123 = arith.divf %121, %122 : vector<8x1xf32>
    %124 = vector.broadcast %123 : vector<8x1xf32> to vector<8x16xf32>
    %125 = arith.subf %117, %124 : vector<8x16xf32>
    %126 = arith.mulf %125, %125 : vector<8x16xf32>
    %cst_67 = arith.constant dense<0.000000e+00> : vector<8xf32>
    %127 = vector.multi_reduction <add>, %126, %cst_67 [1] : vector<8x16xf32> to vector<8xf32>
    %128 = vector.shape_cast %127 : vector<8xf32> to vector<8x1xf32>
    %cst_68 = arith.constant 1.600000e+01 : f32
    %129 = vector.broadcast %cst_68 : f32 to vector<8x1xf32>
    %130 = arith.divf %128, %129 : vector<8x1xf32>
    %131 = vector.broadcast %123 : vector<8x1xf32> to vector<8x16xf32>
    %132 = arith.subf %117, %131 : vector<8x16xf32>
    %cst_69 = arith.constant 9.99999974E-6 : f32
    %133 = vector.broadcast %cst_69 : f32 to vector<8x1xf32>
    %134 = arith.addf %130, %133 : vector<8x1xf32>
    %135 = math.rsqrt %134 : vector<8x1xf32>
    %136 = vector.broadcast %135 : vector<8x1xf32> to vector<8x16xf32>
    %137 = arith.mulf %132, %136 : vector<8x16xf32>
    %138 = vector.broadcast %118 : vector<1x16xf32> to vector<8x16xf32>
    %139 = arith.mulf %137, %138 : vector<8x16xf32>
    %140 = vector.broadcast %119 : vector<1x16xf32> to vector<8x16xf32>
    %141 = arith.addf %139, %140 : vector<8x16xf32>
    %c0_70 = arith.constant 0 : index
    %c0_71 = arith.constant 0 : index
    %142 = vector.load %arg22[%c0_70, %c0_71] : memref<16x192xf32, #tpu.memory_space<vmem>>, vector<16x192xf32>
    %cst_72 = arith.constant dense<0.000000e+00> : vector<8x192xf32>
    %143 = tpu.matmul %141, %142, %cst_72 {dimension_numbers = #tpu.dot_dimension_numbers<[1], [0], [0], [1], [0, 0, 1, 1], [], []>} : vector<8x16xf32>, vector<16x192xf32>, vector<8x192xf32> -> vector<8x192xf32>
    %c0_73 = arith.constant 0 : index
    %c0_74 = arith.constant 0 : index
    %144 = vector.load %arg23[%c0_73, %c0_74] : memref<1x192xf32, #tpu.memory_space<vmem>>, vector<1x192xf32>
    %145 = vector.broadcast %144 : vector<1x192xf32> to vector<8x192xf32>
    %146 = arith.addf %143, %145 : vector<8x192xf32>
    %147 = vector.extract_strided_slice %146 {offsets = [0, 0], sizes = [8, 64], strides = [1, 1]} : vector<8x192xf32> to vector<8x64xf32>
    %148 = arith.negf %147 : vector<8x64xf32>
    %149 = math.exp %148 : vector<8x64xf32>
    %cst_75 = arith.constant 1.000000e+00 : f32
    %150 = vector.broadcast %cst_75 : f32 to vector<8x64xf32>
    %151 = arith.addf %150, %149 : vector<8x64xf32>
    %152 = arith.divf %150, %151 : vector<8x64xf32>
    %153 = vector.extract_strided_slice %146 {offsets = [0, 64], sizes = [8, 64], strides = [1, 1]} : vector<8x192xf32> to vector<8x64xf32>
    %154 = math.tanh %153 : vector<8x64xf32>
    %155 = vector.extract_strided_slice %146 {offsets = [0, 128], sizes = [8, 64], strides = [1, 1]} : vector<8x192xf32> to vector<8x64xf32>
    %156 = arith.negf %155 : vector<8x64xf32>
    %157 = math.exp %156 : vector<8x64xf32>
    %cst_76 = arith.constant 1.000000e+00 : f32
    %158 = vector.broadcast %cst_76 : f32 to vector<8x64xf32>
    %159 = arith.addf %158, %157 : vector<8x64xf32>
    %160 = arith.divf %158, %159 : vector<8x64xf32>
    %161 = arith.mulf %152, %154 : vector<8x64xf32>
    %162 = math.tanh %161 : vector<8x64xf32>
    %163 = arith.mulf %160, %162 : vector<8x64xf32>
    %c0_77 = arith.constant 0 : index
    %c0_78 = arith.constant 0 : index
    %164 = vector.load %arg24[%c0_77, %c0_78] : memref<64x144xf32, #tpu.memory_space<vmem>>, vector<64x144xf32>
    %cst_79 = arith.constant dense<0.000000e+00> : vector<8x144xf32>
    %165 = tpu.matmul %163, %164, %cst_79 {dimension_numbers = #tpu.dot_dimension_numbers<[1], [0], [0], [1], [0, 0, 1, 1], [], []>} : vector<8x64xf32>, vector<64x144xf32>, vector<8x144xf32> -> vector<8x144xf32>
    %c0_80 = arith.constant 0 : index
    %c0_81 = arith.constant 0 : index
    %166 = vector.load %arg25[%c0_80, %c0_81] : memref<1x144xf32, #tpu.memory_space<vmem>>, vector<1x144xf32>
    %167 = vector.broadcast %166 : vector<1x144xf32> to vector<8x144xf32>
    %168 = arith.addf %165, %167 : vector<8x144xf32>
    %169 = vector.extract_strided_slice %168 {offsets = [0, 0], sizes = [8, 48], strides = [1, 1]} : vector<8x144xf32> to vector<8x48xf32>
    %170 = arith.negf %169 : vector<8x48xf32>
    %171 = math.exp %170 : vector<8x48xf32>
    %cst_82 = arith.constant 1.000000e+00 : f32
    %172 = vector.broadcast %cst_82 : f32 to vector<8x48xf32>
    %173 = arith.addf %172, %171 : vector<8x48xf32>
    %174 = arith.divf %172, %173 : vector<8x48xf32>
    %175 = vector.extract_strided_slice %168 {offsets = [0, 48], sizes = [8, 48], strides = [1, 1]} : vector<8x144xf32> to vector<8x48xf32>
    %176 = math.tanh %175 : vector<8x48xf32>
    %177 = vector.extract_strided_slice %168 {offsets = [0, 96], sizes = [8, 48], strides = [1, 1]} : vector<8x144xf32> to vector<8x48xf32>
    %178 = arith.negf %177 : vector<8x48xf32>
    %179 = math.exp %178 : vector<8x48xf32>
    %cst_83 = arith.constant 1.000000e+00 : f32
    %180 = vector.broadcast %cst_83 : f32 to vector<8x48xf32>
    %181 = arith.addf %180, %179 : vector<8x48xf32>
    %182 = arith.divf %180, %181 : vector<8x48xf32>
    %183 = arith.mulf %174, %176 : vector<8x48xf32>
    %184 = math.tanh %183 : vector<8x48xf32>
    %185 = arith.mulf %182, %184 : vector<8x48xf32>
    %c0_84 = arith.constant 0 : index
    %c0_85 = arith.constant 0 : index
    %186 = vector.load %arg26[%c0_84, %c0_85] : memref<48x96xf32, #tpu.memory_space<vmem>>, vector<48x96xf32>
    %cst_86 = arith.constant dense<0.000000e+00> : vector<8x96xf32>
    %187 = tpu.matmul %185, %186, %cst_86 {dimension_numbers = #tpu.dot_dimension_numbers<[1], [0], [0], [1], [0, 0, 1, 1], [], []>} : vector<8x48xf32>, vector<48x96xf32>, vector<8x96xf32> -> vector<8x96xf32>
    %c0_87 = arith.constant 0 : index
    %c0_88 = arith.constant 0 : index
    %188 = vector.load %arg27[%c0_87, %c0_88] : memref<1x96xf32, #tpu.memory_space<vmem>>, vector<1x96xf32>
    %189 = vector.broadcast %188 : vector<1x96xf32> to vector<8x96xf32>
    %190 = arith.addf %187, %189 : vector<8x96xf32>
    %191 = vector.extract_strided_slice %190 {offsets = [0, 0], sizes = [8, 32], strides = [1, 1]} : vector<8x96xf32> to vector<8x32xf32>
    %192 = arith.negf %191 : vector<8x32xf32>
    %193 = math.exp %192 : vector<8x32xf32>
    %cst_89 = arith.constant 1.000000e+00 : f32
    %194 = vector.broadcast %cst_89 : f32 to vector<8x32xf32>
    %195 = arith.addf %194, %193 : vector<8x32xf32>
    %196 = arith.divf %194, %195 : vector<8x32xf32>
    %197 = vector.extract_strided_slice %190 {offsets = [0, 32], sizes = [8, 32], strides = [1, 1]} : vector<8x96xf32> to vector<8x32xf32>
    %198 = math.tanh %197 : vector<8x32xf32>
    %199 = vector.extract_strided_slice %190 {offsets = [0, 64], sizes = [8, 32], strides = [1, 1]} : vector<8x96xf32> to vector<8x32xf32>
    %200 = arith.negf %199 : vector<8x32xf32>
    %201 = math.exp %200 : vector<8x32xf32>
    %cst_90 = arith.constant 1.000000e+00 : f32
    %202 = vector.broadcast %cst_90 : f32 to vector<8x32xf32>
    %203 = arith.addf %202, %201 : vector<8x32xf32>
    %204 = arith.divf %202, %203 : vector<8x32xf32>
    %205 = arith.mulf %196, %198 : vector<8x32xf32>
    %206 = math.tanh %205 : vector<8x32xf32>
    %207 = arith.mulf %204, %206 : vector<8x32xf32>
    %c0_91 = arith.constant 0 : index
    %c0_92 = arith.constant 0 : index
    %208 = vector.load %arg31[%c0_91, %c0_92] : memref<8x32xf32, #tpu.memory_space<vmem>>, vector<8x32xf32>
    tpu.vector_store %arg31[%c0_91, %c0_92], %207 {strides = array<i32>} : memref<8x32xf32, #tpu.memory_space<vmem>>, vector<8x32xf32>,
    %c0_93 = arith.constant 0 : index
    %c0_94 = arith.constant 0 : index
    %209 = vector.load %arg28[%c0_93, %c0_94] : memref<32x1xf32, #tpu.memory_space<vmem>>, vector<32x1xf32>
    %cst_95 = arith.constant dense<0.000000e+00> : vector<8x1xf32>
    %210 = tpu.matmul %207, %209, %cst_95 {dimension_numbers = #tpu.dot_dimension_numbers<[1], [0], [0], [1], [0, 0, 1, 1], [], []>} : vector<8x32xf32>, vector<32x1xf32>, vector<8x1xf32> -> vector<8x1xf32>
    %c0_96 = arith.constant 0 : index
    %c0_97 = arith.constant 0 : index
    %211 = vector.load %arg29[%c0_96, %c0_97] : memref<1x1xf32, #tpu.memory_space<vmem>>, vector<1x1xf32>
    %212 = vector.broadcast %211 : vector<1x1xf32> to vector<8x1xf32>
    %213 = arith.addf %210, %212 : vector<8x1xf32>
    %c0_98 = arith.constant 0 : index
    %c0_99 = arith.constant 0 : index
    %214 = vector.load %arg30[%c0_98, %c0_99] : memref<8x1xf32, #tpu.memory_space<vmem>>, vector<8x1xf32>
    tpu.vector_store %arg30[%c0_98, %c0_99], %213 {strides = array<i32>} : memref<8x1xf32, #tpu.memory_space<vmem>>, vector<8x1xf32>,
    return
  }
}

</mosaic_0001>

<bundles_post_ra>
// kernel: forward.1
= control target key start
LH: loop header
LB: loop body
LE: loop exit
PB: predicated region body
PF: predicated region fallthrough
CT: control target
= control target key end

     0   :  { %s5848_s6 = smov 1   ;;  %s5849_s10 = smov 2   ;;  %s6625_s0 = inlined_call_operand.smem [shape: u32[32], index: -1, kind: input, shape index: {}] }
   0x1   :  { %s5896_s5 = sld [smem:[%s6625_s0]]   ;;  %s5850_s14 = smov 3  }
   0x2   :  { %s5901_s9 = sld [smem:[%s6625_s0 + %s5848_s6]]   ;;  %s5851_s18 = smov 4  }
   0x3   :  { %s5906_s13 = sld [smem:[%s6625_s0 + %s5849_s10]]   ;;  %s5852_s22 = smov 5  }
   0x4   :  { %s5911_s17 = sld [smem:[%s6625_s0 + %s5850_s14]]   ;;  %s5853_s26 = smov 6  }
   0x5   :  { %s5916_s21 = sld [smem:[%s6625_s0 + %s5851_s18]]   ;;  %s5854_s30 = smov 7  }
   0x6   :  { %s5921_s25 = sld [smem:[%s6625_s0 + %s5852_s22]]   ;;  %s5855_s4 = smov 8  }
   0x7   :  { %s5926_s29 = sld [smem:[%s6625_s0 + %s5853_s26]]   ;;  %s5856_s10 = smov 9  }
   0x8   :  { %s5931_s3 = sld [smem:[%s6625_s0 + %s5854_s30]]   ;;  %s5857_s15 = smov 10  }
   0x9   :  { %s5936_s8 = sld [smem:[%s6625_s0 + %s5855_s4]]   ;;  %s5858_s20 = smov 11  }
   0xa   :  { %s5941_s14 = sld [smem:[%s6625_s0 + %s5856_s10]]   ;;  %s5859_s26 = smov 12  }
   0xb   :  { %s5946_s19 = sld [smem:[%s6625_s0 + %s5857_s15]]   ;;  %s5860_s1 = smov 13  }
   0xc   :  { %s5951_s24 = sld [smem:[%s6625_s0 + %s5858_s20]]   ;;  %s5861_s7 = smov 14  }
   0xd   :  { %s5956_s30 = sld [smem:[%s6625_s0 + %s5859_s26]]   ;;  %s5862_s15 = smov 15  }
   0xe   :  { %s5961_s6 = sld [smem:[%s6625_s0 + %s5860_s1]]   ;;  %s5863_s22 = smov 16  }
   0xf   :  { %s5966_s12 = sld [smem:[%s6625_s0 + %s5861_s7]]   ;;  %s5864_s28 = smov 17  }
  0x10   :  { %s5971_s20 = sld [smem:[%s6625_s0 + %s5862_s15]]   ;;  %s5865_s7 = smov 18  }
  0x11   :  { %s5976_s27 = sld [smem:[%s6625_s0 + %s5863_s22]]   ;;  %s5866_s15 = smov 19  }
  0x12   :  { %s5981_s4 = sld [smem:[%s6625_s0 + %s5864_s28]]   ;;  %s5867_s22 = smov 20  }
  0x13   :  { %s5868_s28 = smov 21   ;;  %s5877_s10 = smov 30  }
  0x14   :  { %s5878_s16 = smov 31  }
  0x15   :  { %6632 = sst [smem:[#allocation6_spill]] %s5966_s12 }
  0x16   :  { %6633 = sst [smem:[#allocation7_spill]] %s5971_s20 }
  0x17   :  { %6634 = sst [smem:[#allocation8_spill]] %s5976_s27 }
  0x18   :  { %6635 = sst [smem:[#allocation9_spill]] %s5981_s4 }
  0x19   :  { %s5986_s12 = sld [smem:[%s6625_s0 + %s5865_s7]]   ;;  %s5869_s7 = smov 22  }
  0x1a   :  { %s5991_s20 = sld [smem:[%s6625_s0 + %s5866_s15]]   ;;  %s5870_s15 = smov 23  }
  0x1b   :  { %s5996_s27 = sld [smem:[%s6625_s0 + %s5867_s22]]   ;;  %s5871_s22 = smov 24  }
  0x1c   :  { %s6001_s4 = sld [smem:[%s6625_s0 + %s5868_s28]]   ;;  %s5872_s28 = smov 25  }
  0x1f   :  { %6636 = sst [smem:[#allocation10_spill]] %s5986_s12 }
  0x20   :  { %6637 = sst [smem:[#allocation11_spill]] %s5991_s20 }
  0x21   :  { %6638 = sst [smem:[#allocation12_spill]] %s5996_s27 }
  0x22   :  { %6639 = sst [smem:[#allocation13_spill]] %s6001_s4 }
  0x23   :  { %s6006_s12 = sld [smem:[%s6625_s0 + %s5869_s7]]   ;;  %s5873_s7 = smov 26  }
  0x24   :  { %s6011_s20 = sld [smem:[%s6625_s0 + %s5870_s15]]   ;;  %s5874_s15 = smov 27  }
  0x25   :  { %s6016_s27 = sld [smem:[%s6625_s0 + %s5871_s22]]   ;;  %s5875_s22 = smov 28  }
  0x26   :  { %s6021_s4 = sld [smem:[%s6625_s0 + %s5872_s28]]   ;;  %s5876_s28 = smov 29  }
  0x29   :  { %6640 = sst [smem:[#allocation14_spill]] %s6006_s12 }
  0x2a   :  { %6641 = sst [smem:[#allocation15_spill]] %s6011_s20 }
  0x2b   :  { %6642 = sst [smem:[#allocation16_spill]] %s6016_s27 }
  0x2c   :  { %6643 = sst [smem:[#allocation17_spill]] %s6021_s4 }
  0x2d   :  { %s6026_s12 = sld [smem:[%s6625_s0 + %s5873_s7]]  }
  0x2e   :  { %s6031_s20 = sld [smem:[%s6625_s0 + %s5874_s15]]  }
  0x2f   :  { %s6036_s27 = sld [smem:[%s6625_s0 + %s5875_s22]]  }
  0x30   :  { %s4704_s4 = sld [smem:[%s6625_s0 + %s5876_s28]]  }
  0x33   :  { %6644 = sst [smem:[#allocation18_spill]] %s6026_s12 }
  0x34   :  { %6645 = sst [smem:[#allocation19_spill]] %s6031_s20 }
  0x35   :  { %s6044_s12 = sld [smem:[%s6625_s0 + %s5877_s10]]  }
  0x36   :  { %s6049_s20 = sld [smem:[%s6625_s0 + %s5878_s16]]   ;;  %v69_v0 = vstv %s4704_s4 }
  0x37   :  { %70 = vst [vmem:[#allocation2] sm:$0x1] %v69_v0 }
  0x38   :  { %v142_v1 = vld [vmem:[%s5906_s13] sm:$0xff]  ;;  %v143_v2 = vld [vmem:[%s5906_s13 + $0x8] sm:$0xff]  ;;  %v5879_v4 = vmov 0.0|0.0   ;;  %vm5880_vm0 = vmmov 0   ;;  %v5881_v6 = vmov 0.0   ;;  %vm151_vm1 = vcmask 130048  }
  0x39   :  { %v133_v3 = vld [vmem:[%s5896_s5] sm:$0xff]  ;;  %5447 = vmatprep.subr.bf16.mxu0 %v5879_v4  ;;  %v5448_v5 = vpack.c.bf16 %v143_v2, %v142_v1  ;;  %5411 = vmatprep.mubr.msk.f32.mxu0 %vm5880_vm0, %v5881_v6 }
  0x3a   :  { %v4707_v7 = vld [vmem:[%s5901_s9] ss:$0 sm:$0xff] }
  0x3b   :  { %v141_v8 = vadd.f32 %v4707_v7, %v133_v3  ;;  %5449 = vmatpush3.bf16.msra.mxu0 %v5448_v5 }
  0x3e   :  { %5412 = vmatmul.mubr.msk.f32.vlgmr.msra.gmra.mrb[0].mxu0 %vm151_vm1, %v141_v8 }
  0x3f   :  { %71 = vsyncpa [#allocation4], 0  ;;  %v4708_v9 = vld [vmem:[%s5911_s17] ss:$0 sm:$0xff]  ;;  %v258_v22 = vld [vmem:[%s5916_s21 + $0x8] sm:$0xff]  ;;  %v5882_v28 = vmov 0  }
  0x40   :  { %v257_v20 = vld [vmem:[%s5916_s21] sm:$0xff]  ;;  %v266_v24 = vld [vmem:[%s5916_s21 + $0x48] sm:$0xff]  ;;  %472 = vmatprep.mubr.bf16.mxu1 %v5882_v28  ;;  %513 = vmatprep.mubr.bf16.mxu0 %v5882_v28  ;;  %v259_v29 = vld [vmem:[%s5916_s21 + $0x10] sm:$0xff]  ;;  %s6646_s0 = sld [smem:[#allocation6_spill]]  ;;  %s6647_s5 = sld [smem:[#allocation10_spill]]  ;;  %vm4356_vm2 = vcmask 523264  }
  0x41   :  { %v265_v21 = vld [vmem:[%s5916_s21 + $0x40] sm:$0xff]  ;;  %v4714_v25 = vcombine.low %v258_v22, %v266_v24  ;;  %v4715_v26 = vcombine.high %v258_v22, %v266_v24  ;;  %v267_v30 = vld [vmem:[%s5916_s21 + $0x50] sm:$0xff]  ;;  %v260_v31 = vld [vmem:[%s5916_s21 + $0x18] sm:$0xff]  ;;  %s6648_s9 = sld [smem:[#allocation11_spill]]  ;;  %s6649_s13 = sld [smem:[#allocation8_spill]]  ;;  %vm4475_vm3 = vcmask 261120  }
  0x42   :  { %v4713_v23 = vcombine.high %v257_v20, %v265_v21  ;;  %v4712_v27 = vcombine.low %v257_v20, %v265_v21  ;;  %v4716_v32 = vcombine.low %v259_v29, %v267_v30  ;;  %v4717_v33 = vcombine.high %v259_v29, %v267_v30  ;;  %v268_v34 = vld [vmem:[%s5916_s21 + $0x58] sm:$0xff]  ;;  %v4710_v41 = vld [vmem:[%s5936_s8] ss:$0 sm:$0xff]  ;;  %v262_v48 = vld [vmem:[%s5916_s21 + $0x28] sm:$0xff]  ;;  %s6650_s17 = sld [smem:[#allocation7_spill]]  ;;  %s6655_s8 = sld [smem:[#allocation16_spill]] }
  0x43   :  { %481 = vmatprep.subr.bf16.mxu0 %v4715_v26  ;;  %v4718_v35 = vcombine.low %v260_v31, %v268_v34  ;;  %v4719_v36 = vcombine.high %v260_v31, %v268_v34  ;;  %v4711_v43 = vld [vmem:[%s5941_s14] ss:$0 sm:$0xff]  ;;  %v270_v49 = vld [vmem:[%s5916_s21 + $0x68] sm:$0xff]  ;;  %v263_v53 = vld [vmem:[%s5916_s21 + $0x30] sm:$0xff]  ;;  %s6656_s14 = sld [smem:[#allocation15_spill]]  ;;  %s5885_s4 = smov 96  }
  0x44   :  { %440 = vmatprep.subr.bf16.mxu1 %v4713_v23  ;;  %482 = vmatpush1.bf16.msra.mxu0 %v4714_v25  ;;  %v261_v45 = vld [vmem:[%s5916_s21 + $0x20] sm:$0xff]  ;;  %v4723_v52 = vcombine.high %v262_v48, %v270_v49  ;;  %v271_v54 = vld [vmem:[%s5916_s21 + $0x70] sm:$0xff]  ;;  %v264_v55 = vld [vmem:[%s5916_s21 + $0x38] sm:$0xff]  ;;  %v4722_v58 = vcombine.low %v262_v48, %v270_v49  ;;  %s6659_s22 = sld [smem:[#allocation19_spill]]  ;;  %s5886_s23 = smov 32   ;;  %vm4477_vm4 = vcmask 392192  }
  0x45   :  { %441 = vmatpush1.bf16.msra.mxu1 %v4712_v27  ;;  %563 = vmatprep.subr.bf16.mxu0 %v4719_v36  ;;  %v269_v47 = vld [vmem:[%s5916_s21 + $0x60] sm:$0xff]  ;;  %v272_v56 = vld [vmem:[%s5916_s21 + $0x78] sm:$0xff]  ;;  %v4725_v59 = vcombine.high %v263_v53, %v271_v54  ;;  %v4724_v61 = vcombine.low %v263_v53, %v271_v54  ;;  %v5532_v3 = vld [vmem:[%s5926_s29 + $0x48] sm:$0xff]   ;;  %v277_v36 = vlaneseq  ;;  %s6651_s21 = sld [smem:[#allocation9_spill]]  ;;  %s5887_s26 = smov [#allocation3]  }
  0x46   :  { %522 = vmatprep.subr.bf16.mxu1 %v4717_v33  ;;  %v4721_v51 = vcombine.high %v261_v45, %v269_v47  ;;  %v4720_v57 = vcombine.low %v261_v45, %v269_v47  ;;  %v4727_v60 = vcombine.high %v264_v55, %v272_v56  ;;  %v4726_v62 = vcombine.low %v264_v55, %v272_v56  ;;  %v5528_v63 = vld [vmem:[%s5926_s29 + $0x40] sm:$0xff]   ;;  %v5533_v5 = vld [vmem:[%s5926_s29 + $0xc8] sm:$0xff]   ;;  %v5552_v25 = vld [vmem:[%s5926_s29 + $0x70] sm:$0xff]   ;;  %s4666_s28 = sshll.u32 %s5887_s26, 4  ;;  %s4667_s28 = int_to_ptr.vmem [resolvable:$true] %s4666_s28 }
  0x47   :  { %v5529_v0 = vld [vmem:[%s5926_s29 + $0xc0] sm:$0xff]   ;;  %v5534_v7 = vld [vmem:[%s5926_s29 + $0x8] sm:$0xff]   ;;  %v5553_v26 = vld [vmem:[%s5926_s29 + $0xf0] sm:$0xff]   ;;  %p5829_p1 = scmp.lt.s32.totalorder %s4667_s28, %s4667_s28 }
  0x48   :  { %v5530_v1 = vld [vmem:[%s5926_s29] sm:$0xff]   ;;  %v5548_v21 = vld [vmem:[%s5926_s29 + $0x68] sm:$0xff]   ;;  %v5554_v27 = vld [vmem:[%s5926_s29 + $0x30] sm:$0xff]  }
  0x49   :  { %v5531_v2 = vld [vmem:[%s5926_s29 + $0x80] sm:$0xff]   ;;  %v5549_v22 = vld [vmem:[%s5926_s29 + $0xe8] sm:$0xff]   ;;  %v5555_v29 = vld [vmem:[%s5926_s29 + $0xb0] sm:$0xff]  }
  0x4a   :  { %v5547_v20 = vld [vmem:[%s5926_s29 + $0xa0] sm:$0xff]   ;;  %v5550_v23 = vld [vmem:[%s5926_s29 + $0x28] sm:$0xff]   ;;  %v5556_v30 = vld [vmem:[%s5926_s29 + $0x78] sm:$0xff]  }
  0x4b   :  { %v5551_v24 = vld [vmem:[%s5926_s29 + $0xa8] sm:$0xff]   ;;  %v5557_v31 = vld [vmem:[%s5926_s29 + $0xf8] sm:$0xff]   ;;  %v5560_v34 = vld [vmem:[%s5926_s29 + $0x140] sm:$0xff]  }
  0x4c   :  { %v5559_v33 = vld [vmem:[%s5926_s29 + $0xb8] sm:$0xff]  }
 0x111   :  { %v221_v10 = vpop.f32.mrb[0].mxu0 }
 0x112   :  { %v222_v11 = vadd.f32 %v4708_v9, %v221_v10  ;;  %v5413_v12 = vpop.f32.mrb[1].mxu0  ;;  %v5536_v9 = vld [vmem:[%s5926_s29 + $0x50] sm:$0xff]  }
 0x113   :  { %v5537_v10 = vld [vmem:[%s5926_s29 + $0xd0] sm:$0xff]  }
 0x114   :  { %v225_v13 = vadd.f32 %v222_v11, %v141_v8  ;;  %v5535_v8 = vld [vmem:[%s5926_s29 + $0x88] sm:$0xff]   ;;  %v5538_v11 = vld [vmem:[%s5926_s29 + $0x10] sm:$0xff]  }
 0x115   :  { %v5539_v12 = vld [vmem:[%s5926_s29 + $0x90] sm:$0xff]  }
 0x116   :  { %v228_v14 = vsel %vm151_vm1, %v225_v13, 0.0 }
 0x117   :  { %229 = vadd.xlane.f32.xlu0 %v228_v14  ;;  %v5541_v14 = vld [vmem:[%s5926_s29 + $0xd8] sm:$0xff]  }
 0x1a4   :  { %v230_v15 = vpop.xlane.xlu0 %229 }
 0x1a5   :  { %v232_v16 = vmul.f32 0.0625, %v230_v15  ;;  %v5542_v15 = vld [vmem:[%s5926_s29 + $0x18] sm:$0xff]  }
 0x1a7   :  { %v233_v17 = vsub.f32 %v225_v13, %v232_v16  ;;  %v5540_v13 = vld [vmem:[%s5926_s29 + $0x58] sm:$0xff]  }
 0x1a8   :  { %v5543_v16 = vld [vmem:[%s5926_s29 + $0x98] sm:$0xff]  }
 0x1a9   :  { %v234_v18 = vmul.f32 %v233_v17, %v233_v17 }
 0x1ab   :  { %v235_v19 = vsel %vm151_vm1, %v234_v18, 0.0  ;;  %v5545_v18 = vld [vmem:[%s5926_s29 + $0xe0] sm:$0xff]  }
 0x1ac   :  { %236 = vadd.xlane.f32.xlu0 %v235_v19  ;;  %v5546_v19 = vld [vmem:[%s5926_s29 + $0x20] sm:$0xff]  }
 0x239   :  { %v237_v37 = vpop.xlane.xlu0 %236 }
 0x23a   :  { %v238_v38 = vmul.f32 0.0625, %v237_v37  ;;  %v6134_v37 = vshrl.u32 %v277_v36, 7  ;;  %v5573_v36 = vld [vmem:[%s5926_s29 + $0x1d8] sm:$0xff]  }
 0x23c   :  { %v239_v39 = vadd.f32 1e-05, %v238_v38  ;;  %v6137_v38 = vsub.s32 0, %v6134_v37 }
 0x23e   :  { %5784 = vrsqrt.f32 %v239_v39  ;;  %v6140_v39 = vsub.s32 2, %v6134_v37 }
 0x248   :  { %v5785_v40 = vpop.eup %5784 }
 0x249   :  { %v241_v42 = vmul.f32 %v5785_v40, %v233_v17  ;;  %v5544_v17 = vld [vmem:[%s5926_s29 + $0x60] sm:$0xff]  }
 0x24a   :  { %v6143_v40 = vld [vmem:[%s5921_s25] sm:$0xff] }
 0x24b   :  { %v248_v44 = vmul.f32 %v4710_v41, %v241_v42  ;;  %v6146_v41 = vsub.s32 1, %v6134_v37  ;;  %v6149_v42 = vsub.s32 3, %v6134_v37 }
 0x24d   :  { %v6075_v46 = vadd.f32 %v4711_v43, %v248_v44  ;;  %v280_v43 = vrot.slane %v6143_v40, %v6137_v38  ;;  %v288_v44 = vrot.slane %v6143_v40, %v6140_v39  ;;  %v284_v45 = vrot.slane %v6143_v40, %v6146_v41 }
 0x24e   :  { %v292_v47 = vrot.slane %v6143_v40, %v6149_v42 }
 0x24f   :  { %v256_v50 = vpack.c.bf16 %v6075_v46, %v6075_v46 }
 0x251   :  { %4728 = vmatmul.mubr.msk.bf16.vlgmr.msra.gmra.mrb[0].mxu1 %vm151_vm1, %v256_v50  ;;  %4729 = vmatmul.mubr.msk.bf16.vlgmr.msra.gmra.mrb[4].mxu0 %vm151_vm1, %v256_v50 }
 0x252   :  { %523 = vmatpush1.bf16.msra.mxu1 %v4716_v32  ;;  %564 = vmatpush1.bf16.msra.mxu0 %v4718_v35  ;;  %v5558_v32 = vld [vmem:[%s5926_s29 + $0x38] sm:$0xff]   ;;  %v5561_v35 = vld [vmem:[%s5926_s29 + $0x1c0] sm:$0xff]  }
 0x253   :  { %554 = vmatprep.mubr.bf16.mxu1 %v5882_v28  ;;  %595 = vmatprep.mubr.bf16.mxu0 %v5882_v28 }
 0x254   :  { %604 = vmatprep.subr.bf16.mxu1 %v4721_v51  ;;  %645 = vmatprep.subr.bf16.mxu0 %v4723_v52 }
 0x259   :  { %4730 = vmatmul.mubr.msk.bf16.vlgmr.msra.gmra.mrb[4].mxu1 %vm151_vm1, %v256_v50  ;;  %4731 = vmatmul.mubr.msk.bf16.vlgmr.msra.gmra.mrb[8].mxu0 %vm151_vm1, %v256_v50 }
 0x25a   :  { %605 = vmatpush1.bf16.msra.mxu1 %v4720_v57  ;;  %646 = vmatpush1.bf16.msra.mxu0 %v4722_v58  ;;  %v6160_v58 = vsub.s32 5, %v6134_v37 }
 0x25b   :  { %636 = vmatprep.mubr.bf16.mxu1 %v5882_v28  ;;  %677 = vmatprep.mubr.bf16.mxu0 %v5882_v28 }
 0x25c   :  { %686 = vmatprep.subr.bf16.mxu1 %v4725_v59  ;;  %727 = vmatprep.subr.bf16.mxu0 %v4727_v60  ;;  %v6163_v59 = vsub.s32 7, %v6134_v37 }
 0x261   :  { %4732 = vmatmul.mubr.msk.bf16.vlgmr.msra.gmra.mrb[8].mxu1 %vm151_vm1, %v256_v50  ;;  %4733 = vmatmul.mubr.msk.bf16.vlgmr.msra.gmra.mrb[12].mxu0 %vm151_vm1, %v256_v50 }
 0x262   :  { %687 = vmatpush1.bf16.msra.mxu1 %v4724_v61  ;;  %728 = vmatpush1.bf16.msra.mxu0 %v4726_v62 }
 0x263   :  { %718 = vmatprep.mubr.bf16.mxu1 %v5882_v28  ;;  %759 = vmatprep.mubr.bf16.mxu0 %v5882_v28 }
 0x264   :  { %5040 = vmatprep.subr.bf16.mxu1 %v5528_v63  ;;  %5062 = vmatprep.subr.bf16.mxu0 %v5529_v0 }
 0x269   :  { %4734 = vmatmul.mubr.msk.bf16.vlgmr.msra.gmra.mrb[12].mxu1 %vm151_vm1, %v256_v50  ;;  %4735 = vmatmul.mubr.msk.bf16.vlgmr.msra.gmra.mrb[16].mxu0 %vm151_vm1, %v256_v50 }
 0x26a   :  { %5041 = vmatpush3.bf16.msra.mxu1 %v5530_v1  ;;  %5063 = vmatpush3.bf16.msra.mxu0 %v5531_v2 }
 0x26b   :  { %5042 = vmatprep.subr.bf16.mxu1 %v5532_v3  ;;  %5064 = vmatprep.subr.bf16.mxu0 %v5533_v5  ;;  %v300_v5 = vrot.slane %v6143_v40, %v6160_v58 }
 0x26e   :  { %5043 = vmatpush3.bf16.msra.mxu1 %v5534_v7  ;;  %5065 = vmatpush3.bf16.msra.mxu0 %v5535_v8  ;;  %v308_v7 = vrot.slane %v6143_v40, %v6163_v59  ;;  %v5562_v8 = vld [vmem:[%s5926_s29 + $0x100] sm:$0xff]  }
 0x26f   :  { %5044 = vmatprep.subr.bf16.mxu1 %v5536_v9  ;;  %5066 = vmatprep.subr.bf16.mxu0 %v5537_v10  ;;  %v5563_v9 = vld [vmem:[%s5926_s29 + $0x180] sm:$0xff]  }
 0x272   :  { %5045 = vmatpush3.bf16.msra.mxu1 %v5538_v11  ;;  %5067 = vmatpush3.bf16.msra.mxu0 %v5539_v12  ;;  %v5564_v12 = vld [vmem:[%s5926_s29 + $0x148] sm:$0xff]  }
 0x273   :  { %5046 = vmatprep.subr.bf16.mxu1 %v5540_v13  ;;  %5068 = vmatprep.subr.bf16.mxu0 %v5541_v14  ;;  %v5565_v13 = vld [vmem:[%s5926_s29 + $0x1c8] sm:$0xff]  }
 0x276   :  { %5047 = vmatpush3.bf16.msra.mxu1 %v5542_v15  ;;  %5069 = vmatpush3.bf16.msra.mxu0 %v5543_v16 }
 0x277   :  { %5048 = vmatprep.subr.bf16.mxu1 %v5544_v17  ;;  %5070 = vmatprep.subr.bf16.mxu0 %v5545_v18 }
 0x27a   :  { %5049 = vmatpush3.bf16.msra.mxu1 %v5546_v19  ;;  %5071 = vmatpush3.bf16.msra.mxu0 %v5547_v20 }
 0x27b   :  { %5050 = vmatprep.subr.bf16.mxu1 %v5548_v21  ;;  %5072 = vmatprep.subr.bf16.mxu0 %v5549_v22  ;;  %v5566_v22 = vld [vmem:[%s5926_s29 + $0x108] sm:$0xff]  }
 0x27e   :  { %5051 = vmatpush3.bf16.msra.mxu1 %v5550_v23  ;;  %5073 = vmatpush3.bf16.msra.mxu0 %v5551_v24  ;;  %v5567_v23 = vld [vmem:[%s5926_s29 + $0x188] sm:$0xff]  }
 0x27f   :  { %5052 = vmatprep.subr.bf16.mxu1 %v5552_v25  ;;  %5074 = vmatprep.subr.bf16.mxu0 %v5553_v26  ;;  %v5568_v26 = vld [vmem:[%s5926_s29 + $0x150] sm:$0xff]  }
 0x282   :  { %5053 = vmatpush3.bf16.msra.mxu1 %v5554_v27  ;;  %5075 = vmatpush3.bf16.msra.mxu0 %v5555_v29  ;;  %v5569_v27 = vld [vmem:[%s5926_s29 + $0x1d0] sm:$0xff]  }
 0x283   :  { %5054 = vmatprep.subr.bf16.mxu1 %v5556_v30  ;;  %5076 = vmatprep.subr.bf16.mxu0 %v5557_v31 }
 0x286   :  { %5055 = vmatpush3.bf16.msra.mxu1 %v5558_v32  ;;  %5077 = vmatpush3.bf16.msra.mxu0 %v5559_v33  ;;  %v5570_v33 = vld [vmem:[%s5926_s29 + $0x110] sm:$0xff]  }
 0x287   :  { %5084 = vmatprep.subr.bf16.mxu1 %v5560_v34  ;;  %5106 = vmatprep.subr.bf16.mxu0 %v5561_v35  ;;  %v5571_v34 = vld [vmem:[%s5926_s29 + $0x190] sm:$0xff]   ;;  %v5572_v35 = vld [vmem:[%s5926_s29 + $0x158] sm:$0xff]  }
 0x324   :  { %v474_v48 = vpop.f32.mrb[0].mxu1  ;;  %v515_v49 = vpop.f32.mrb[4].mxu0 }
 0x325   :  { %v475_v50 = vadd.f32 %v474_v48, %v280_v43  ;;  %v516_v51 = vadd.f32 %v515_v49, %v288_v44  ;;  %v476_v52 = vpop.f32.mrb[1].mxu1  ;;  %v517_v53 = vpop.f32.mrb[5].mxu0 }
 0x326   :  { %v477_v54 = vadd.f32 %v476_v52, %v284_v45  ;;  %v518_v55 = vadd.f32 %v517_v53, %v292_v47  ;;  %v478_v56 = vpop.f32.mrb[2].mxu1  ;;  %v519_v57 = vpop.f32.mrb[6].mxu0  ;;  %v6192_v52 = vsub.s32 6, %v6134_v37 }
 0x327   :  { %v768_v60 = vmax.f32 %v475_v50, 0.0  ;;  %v770_v61 = vmax.f32 %v516_v51, 0.0  ;;  %v479_v62 = vpop.f32.mrb[3].mxu1  ;;  %v520_v63 = vpop.f32.mrb[7].mxu0  ;;  %v5574_v50 = vld [vmem:[%s5926_s29 + $0x118] sm:$0xff]   ;;  %v5577_v56 = vld [vmem:[%s5926_s29 + $0x1e0] sm:$0xff]  }
 0x328   :  { %v769_v0 = vmax.f32 %v477_v54, 0.0  ;;  %v771_v1 = vmax.f32 %v518_v55, 0.0  ;;  %v5575_v51 = vld [vmem:[%s5926_s29 + $0x198] sm:$0xff]   ;;  %v5576_v55 = vld [vmem:[%s5926_s29 + $0x160] sm:$0xff]   ;;  %v6197_v57 = vld [vmem:[%s5921_s25 + $0x8] sm:$0xff]  ;;  %v6204_v63 = vsub.s32 4, %v6134_v37 }
 0x329   :  { %v784_v10 = vpack.c.bf16 %v768_v60, %v768_v60  ;;  %v786_v11 = vpack.c.bf16 %v770_v61, %v770_v61  ;;  %v336_v60 = vrot.slane %v6197_v57, %v6192_v52  ;;  %v5578_v61 = vld [vmem:[%s5926_s29 + $0x120] sm:$0xff]   ;;  %s6652_s25 = sld [smem:[#allocation14_spill]] }
 0x32a   :  { %v785_v2 = vpack.c.bf16 %v769_v0, %v769_v0  ;;  %v787_v3 = vpack.c.bf16 %v771_v1, %v771_v1  ;;  %v5579_v62 = vld [vmem:[%s5926_s29 + $0x1a0] sm:$0xff]   ;;  %v5580_v0 = vld [vmem:[%s5926_s29 + $0x168] sm:$0xff]  }
 0x32b   :  { %v5581_v1 = vld [vmem:[%s5926_s29 + $0x1e8] sm:$0xff]  }
 0x32c   :  { %v6173_v14 = vpop.f32.mrb[4].mxu1  ;;  %v6175_v15 = vpop.f32.mrb[8].mxu0  ;;  %1863 = vmatprep.mubr.bf16.mxu1 %v785_v2  ;;  %1903 = vmatprep.mubr.bf16.mxu0 %v787_v3 }
 0x32d   :  { %v558_v16 = vpop.f32.mrb[5].mxu1  ;;  %v599_v17 = vpop.f32.mrb[9].mxu0  ;;  %1864 = vmatmul.mubr.bf16.vlgmr.msra.gmra.mrb[16].mxu1 %v784_v10  ;;  %1904 = vmatmul.mubr.bf16.vlgmr.msra.gmra.mrb[20].mxu0 %v786_v11  ;;  %v5582_v10 = vld [vmem:[%s5926_s29 + $0x128] sm:$0xff]  }
 0x32e   :  { %v559_v18 = vadd.f32 %v558_v16, %v300_v5  ;;  %v600_v19 = vadd.f32 %v599_v17, %v308_v7  ;;  %5085 = vmatpush3.bf16.msra.mxu1 %v5562_v8  ;;  %5107 = vmatpush3.bf16.msra.mxu0 %v5563_v9  ;;  %v560_v20 = vpop.f32.mrb[6].mxu1  ;;  %v601_v21 = vpop.f32.mrb[10].mxu0  ;;  %v5583_v11 = vld [vmem:[%s5926_s29 + $0x1a8] sm:$0xff]  }
 0x32f   :  { %v561_v24 = vpop.f32.mrb[7].mxu1  ;;  %v602_v25 = vpop.f32.mrb[11].mxu0  ;;  %5086 = vmatprep.subr.bf16.mxu1 %v5564_v12  ;;  %5108 = vmatprep.subr.bf16.mxu0 %v5565_v13  ;;  %v296_v12 = vrot.slane %v6143_v40, %v6204_v63  ;;  %v304_v13 = vrot.slane %v6143_v40, %v6192_v52  ;;  %v316_v20 = vrot.slane %v6197_v57, %v6146_v41  ;;  %v5587_v40 = vld [vmem:[%s5926_s29 + $0x1b0] sm:$0xff]  }
 0x330   :  { %v773_v29 = vmax.f32 %v559_v18, 0.0  ;;  %v775_v30 = vmax.f32 %v600_v19, 0.0  ;;  %v5584_v18 = vld [vmem:[%s5926_s29 + $0x170] sm:$0xff]   ;;  %v324_v21 = vrot.slane %v6197_v57, %v6149_v42  ;;  %v5588_v25 = vld [vmem:[%s5926_s29 + $0x178] sm:$0xff]  }
 0x331   :  { %v5585_v19 = vld [vmem:[%s5926_s29 + $0x1f0] sm:$0xff]   ;;  %v598_v24 = vadd.f32 %v6175_v15, %v304_v13  ;;  %v5593_v15 = vld [vmem:[%s5926_s29 + $0x2c0] sm:$0xff]   ;;  %v5612_v13 = vld [vmem:[%s5926_s29 + $0x268] sm:$0xff]  }
 0x332   :  { %v789_v31 = vpack.c.bf16 %v773_v29, %v773_v29  ;;  %v791_v32 = vpack.c.bf16 %v775_v30, %v775_v30  ;;  %5087 = vmatpush3.bf16.msra.mxu1 %v5566_v22  ;;  %5109 = vmatpush3.bf16.msra.mxu0 %v5567_v23  ;;  %v5586_v22 = vld [vmem:[%s5926_s29 + $0x130] sm:$0xff]   ;;  %v557_v23 = vadd.f32 %v6173_v14, %v296_v12  ;;  %v5590_v30 = vld [vmem:[%s5926_s29 + $0x138] sm:$0xff]   ;;  %v5592_v14 = vld [vmem:[%s5926_s29 + $0x240] sm:$0xff]  }
 0x333   :  { %5088 = vmatprep.subr.bf16.mxu1 %v5568_v26  ;;  %5110 = vmatprep.subr.bf16.mxu0 %v5569_v27  ;;  %v5589_v26 = vld [vmem:[%s5926_s29 + $0x1f8] sm:$0xff]   ;;  %v5611_v12 = vld [vmem:[%s5926_s29 + $0x2a0] sm:$0xff]  }
 0x334   :  { %v6185_v43 = vpop.f32.mrb[8].mxu1  ;;  %v6187_v44 = vpop.f32.mrb[12].mxu0  ;;  %1943 = vmatprep.mubr.bf16.mxu1 %v789_v31  ;;  %1983 = vmatprep.mubr.bf16.mxu0 %v791_v32  ;;  %v5591_v31 = vld [vmem:[%s5926_s29 + $0x1b8] sm:$0xff]   ;;  %v772_v32 = vmax.f32 %v557_v23, 0.0  ;;  %v340_v23 = vrot.slane %v6197_v57, %v6163_v59 }
 0x335   :  { %v640_v45 = vpop.f32.mrb[9].mxu1  ;;  %v681_v47 = vpop.f32.mrb[13].mxu0 }
 0x336   :  { %5089 = vmatpush3.bf16.msra.mxu1 %v5570_v33  ;;  %5111 = vmatpush3.bf16.msra.mxu0 %v5571_v34  ;;  %v642_v48 = vpop.f32.mrb[10].mxu1  ;;  %v683_v49 = vpop.f32.mrb[14].mxu0  ;;  %v641_v27 = vadd.f32 %v640_v45, %v316_v20  ;;  %v682_v29 = vadd.f32 %v681_v47, %v324_v21  ;;  %v774_v33 = vmax.f32 %v598_v24, 0.0  ;;  %v788_v45 = vpack.c.bf16 %v772_v32, %v772_v32  ;;  %v5616_v20 = vld [vmem:[%s5926_s29 + $0x270] sm:$0xff]  }
 0x337   :  { %v643_v53 = vpop.f32.mrb[11].mxu1  ;;  %v684_v54 = vpop.f32.mrb[15].mxu0  ;;  %5090 = vmatprep.subr.bf16.mxu1 %v5572_v35  ;;  %5112 = vmatprep.subr.bf16.mxu0 %v5573_v36  ;;  %v5594_v36 = vld [vmem:[%s5926_s29 + $0x200] sm:$0xff]   ;;  %v320_v21 = vrot.slane %v6197_v57, %v6140_v39  ;;  %v5618_v24 = vld [vmem:[%s5926_s29 + $0x230] sm:$0xff]  }
 0x338   :  { %v777_v34 = vmax.f32 %v641_v27, 0.0  ;;  %v779_v35 = vmax.f32 %v682_v29, 0.0  ;;  %v790_v47 = vpack.c.bf16 %v774_v33, %v774_v33  ;;  %v5595_v48 = vld [vmem:[%s5926_s29 + $0x280] sm:$0xff]   ;;  %v5598_v54 = vld [vmem:[%s5926_s29 + $0x208] sm:$0xff]   ;;  %v5620_v27 = vld [vmem:[%s5926_s29 + $0x278] sm:$0xff]  }
 0x339   :  { %v680_v29 = vadd.f32 %v6187_v44, %v320_v21  ;;  %v5622_v33 = vld [vmem:[%s5926_s29 + $0x238] sm:$0xff]   ;;  %v5625_v44 = vld [vmem:[%s5926_s29 + $0x3c0] sm:$0xff]   ;;  %v5650_v21 = vld [vmem:[%s5926_s29 + $0x330] sm:$0xff]  }
 0x33a   :  { %5091 = vmatpush3.bf16.msra.mxu1 %v5574_v50  ;;  %5113 = vmatpush3.bf16.msra.mxu0 %v5575_v51  ;;  %v793_v49 = vpack.c.bf16 %v777_v34, %v777_v34  ;;  %v5596_v50 = vld [vmem:[%s5926_s29 + $0x248] sm:$0xff]   ;;  %v795_v53 = vpack.c.bf16 %v779_v35, %v779_v35 }
 0x33b   :  { %5092 = vmatprep.subr.bf16.mxu1 %v5576_v55  ;;  %5114 = vmatprep.subr.bf16.mxu0 %v5577_v56  ;;  %v5597_v51 = vld [vmem:[%s5926_s29 + $0x2c8] sm:$0xff]   ;;  %v5600_v56 = vld [vmem:[%s5926_s29 + $0x250] sm:$0xff]   ;;  %v778_v34 = vmax.f32 %v680_v29, 0.0 }
 0x33c   :  { %v6208_v2 = vpop.f32.mrb[12].mxu1  ;;  %v761_v3 = vpop.f32.mrb[16].mxu0  ;;  %v5599_v55 = vld [vmem:[%s5926_s29 + $0x288] sm:$0xff]  }
 0x33d   :  { %v6210_v5 = vadd.f32 %v761_v3, %v336_v60  ;;  %v6212_v7 = vpop.f32.mrb[13].mxu1  ;;  %v6214_v8 = vpop.f32.mrb[17].mxu0  ;;  %v5601_v60 = vld [vmem:[%s5926_s29 + $0x2d0] sm:$0xff]   ;;  %v5606_v3 = vld [vmem:[%s5926_s29 + $0x218] sm:$0xff]  }
 0x33e   :  { %5093 = vmatpush3.bf16.msra.mxu1 %v5578_v61  ;;  %5115 = vmatpush3.bf16.msra.mxu0 %v5579_v62  ;;  %v724_v9 = vpop.f32.mrb[14].mxu1  ;;  %v765_v37 = vpop.f32.mrb[18].mxu0  ;;  %v5602_v61 = vld [vmem:[%s5926_s29 + $0x210] sm:$0xff]   ;;  %v764_v32 = vadd.f32 %v6214_v8, %v340_v23  ;;  %v5627_v8 = vld [vmem:[%s5926_s29 + $0x380] sm:$0xff]   ;;  %v5652_v23 = vld [vmem:[%s5926_s29 + $0x378] sm:$0xff]  }
 0x33f   :  { %v725_v16 = vpop.f32.mrb[15].mxu1  ;;  %v766_v17 = vpop.f32.mrb[19].mxu0  ;;  %5094 = vmatprep.subr.bf16.mxu1 %v5580_v0  ;;  %5116 = vmatprep.subr.bf16.mxu0 %v5581_v1  ;;  %v5603_v62 = vld [vmem:[%s5926_s29 + $0x290] sm:$0xff]   ;;  %v5604_v0 = vld [vmem:[%s5926_s29 + $0x258] sm:$0xff]   ;;  %v5608_v37 = vld [vmem:[%s5926_s29 + $0x260] sm:$0xff]  }
 0x340   :  { %v5605_v1 = vld [vmem:[%s5926_s29 + $0x2d8] sm:$0xff]   ;;  %v5613_v16 = vld [vmem:[%s5926_s29 + $0x2e8] sm:$0xff]  }
 0x341   :  { %v5607_v9 = vld [vmem:[%s5926_s29 + $0x298] sm:$0xff]   ;;  %v5614_v17 = vld [vmem:[%s5926_s29 + $0x228] sm:$0xff]  }
 0x342   :  { %5095 = vmatpush3.bf16.msra.mxu1 %v5582_v10  ;;  %5117 = vmatpush3.bf16.msra.mxu0 %v5583_v11  ;;  %v5609_v10 = vld [vmem:[%s5926_s29 + $0x2e0] sm:$0xff]  }
 0x343   :  { %5096 = vmatprep.subr.bf16.mxu1 %v5584_v18  ;;  %5118 = vmatprep.subr.bf16.mxu0 %v5585_v19  ;;  %v5610_v11 = vld [vmem:[%s5926_s29 + $0x220] sm:$0xff]   ;;  %v312_v18 = vrot.slane %v6197_v57, %v6137_v38  ;;  %v5615_v19 = vld [vmem:[%s5926_s29 + $0x2a8] sm:$0xff]  }
 0x346   :  { %5097 = vmatpush3.bf16.msra.mxu1 %v5586_v22  ;;  %5119 = vmatpush3.bf16.msra.mxu0 %v5587_v40  ;;  %v5617_v22 = vld [vmem:[%s5926_s29 + $0x2f0] sm:$0xff]   ;;  %v332_v40 = vrot.slane %v6197_v57, %v6160_v58 }
 0x347   :  { %5098 = vmatprep.subr.bf16.mxu1 %v5588_v25  ;;  %5120 = vmatprep.subr.bf16.mxu0 %v5589_v26  ;;  %v639_v25 = vadd.f32 %v6185_v43, %v312_v18  ;;  %v5619_v26 = vld [vmem:[%s5926_s29 + $0x2b0] sm:$0xff]   ;;  %v5623_v43 = vld [vmem:[%s5926_s29 + $0x2b8] sm:$0xff]   ;;  %v5647_v18 = vld [vmem:[%s5926_s29 + $0x3a8] sm:$0xff]  }
 0x34a   :  { %5099 = vmatpush3.bf16.msra.mxu1 %v5590_v30  ;;  %5121 = vmatpush3.bf16.msra.mxu0 %v5591_v31  ;;  %v5621_v30 = vld [vmem:[%s5926_s29 + $0x2f8] sm:$0xff]   ;;  %v723_v31 = vadd.f32 %v6212_v7, %v332_v40  ;;  %v5626_v7 = vld [vmem:[%s5926_s29 + $0x300] sm:$0xff]   ;;  %v5651_v40 = vld [vmem:[%s5926_s29 + $0x3b0] sm:$0xff]  }
 0x34b   :  { %5128 = vmatprep.subr.bf16.mxu1 %v5592_v14  ;;  %5150 = vmatprep.subr.bf16.mxu0 %v5593_v15  ;;  %v776_v14 = vmax.f32 %v639_v25, 0.0  ;;  %v5624_v15 = vld [vmem:[%s5926_s29 + $0x340] sm:$0xff]  }
 0x34c   :  { %v781_v35 = vmax.f32 %v723_v31, 0.0 }
 0x34d   :  { %1944 = vmatmul.mubr.bf16.vlgmr.msra.gmra.mrb[20].mxu1 %v788_v45  ;;  %1984 = vmatmul.mubr.bf16.vlgmr.msra.gmra.mrb[24].mxu0 %v790_v47  ;;  %v792_v45 = vpack.c.bf16 %v776_v14, %v776_v14  ;;  %v794_v47 = vpack.c.bf16 %v778_v34, %v778_v34 }
 0x34e   :  { %5129 = vmatpush3.bf16.msra.mxu1 %v5594_v36  ;;  %2023 = vmatprep.mubr.bf16.mxu1 %v793_v49  ;;  %v783_v36 = vmax.f32 %v764_v32, 0.0  ;;  %v797_v49 = vpack.c.bf16 %v781_v35, %v781_v35  ;;  %v4736_v32 = vld [vmem:[%s5931_s3] ss:$0 sm:$0xff]  ;;  %s6654_s3 = sld [smem:[#allocation13_spill]] }
 0x34f   :  { %5151 = vmatpush3.bf16.msra.mxu0 %v5595_v48  ;;  %2063 = vmatprep.mubr.bf16.mxu0 %v795_v53  ;;  %v5628_v48 = vld [vmem:[%s5926_s29 + $0x348] sm:$0xff]  }
 0x350   :  { %5130 = vmatprep.subr.bf16.mxu1 %v5596_v50  ;;  %5152 = vmatprep.subr.bf16.mxu0 %v5597_v51  ;;  %v5629_v50 = vld [vmem:[%s5926_s29 + $0x3c8] sm:$0xff]   ;;  %v799_v51 = vpack.c.bf16 %v783_v36, %v783_v36 }
 0x351   :  { %v5630_v53 = vld [vmem:[%s5926_s29 + $0x308] sm:$0xff]  }
 0x352   :  { %5131 = vmatpush3.bf16.msra.mxu1 %v5598_v54  ;;  %v5631_v54 = vld [vmem:[%s5926_s29 + $0x388] sm:$0xff]  }
 0x353   :  { %5153 = vmatpush3.bf16.msra.mxu0 %v5599_v55  ;;  %5132 = vmatprep.subr.bf16.mxu1 %v5600_v56  ;;  %v5632_v55 = vld [vmem:[%s5926_s29 + $0x350] sm:$0xff]  }
 0x354   :  { %5154 = vmatprep.subr.bf16.mxu0 %v5601_v60  ;;  %v5633_v56 = vld [vmem:[%s5926_s29 + $0x3d0] sm:$0xff]  }
 0x355   :  { %v5634_v60 = vld [vmem:[%s5926_s29 + $0x310] sm:$0xff]  }
 0x356   :  { %5133 = vmatpush3.bf16.msra.mxu1 %v5602_v61  ;;  %v5635_v61 = vld [vmem:[%s5926_s29 + $0x390] sm:$0xff]  }
 0x357   :  { %5155 = vmatpush3.bf16.msra.mxu0 %v5603_v62  ;;  %5134 = vmatprep.subr.bf16.mxu1 %v5604_v0  ;;  %v5636_v62 = vld [vmem:[%s5926_s29 + $0x358] sm:$0xff]  }
 0x358   :  { %5156 = vmatprep.subr.bf16.mxu0 %v5605_v1  ;;  %v5637_v0 = vld [vmem:[%s5926_s29 + $0x3d8] sm:$0xff]  }
 0x359   :  { %v5638_v1 = vld [vmem:[%s5926_s29 + $0x318] sm:$0xff]  }
 0x35a   :  { %5135 = vmatpush3.bf16.msra.mxu1 %v5606_v3  ;;  %v5639_v3 = vld [vmem:[%s5926_s29 + $0x398] sm:$0xff]  }
 0x35b   :  { %5157 = vmatpush3.bf16.msra.mxu0 %v5607_v9  ;;  %5136 = vmatprep.subr.bf16.mxu1 %v5608_v37  ;;  %v5640_v9 = vld [vmem:[%s5926_s29 + $0x360] sm:$0xff]  }
 0x35c   :  { %5158 = vmatprep.subr.bf16.mxu0 %v5609_v10  ;;  %v5641_v37 = vld [vmem:[%s5926_s29 + $0x3e0] sm:$0xff]  }
 0x35d   :  { %v5642_v10 = vld [vmem:[%s5926_s29 + $0x320] sm:$0xff]  }
 0x35e   :  { %5137 = vmatpush3.bf16.msra.mxu1 %v5610_v11  ;;  %v5643_v11 = vld [vmem:[%s5926_s29 + $0x3a0] sm:$0xff]  }
 0x35f   :  { %5159 = vmatpush3.bf16.msra.mxu0 %v5611_v12  ;;  %5138 = vmatprep.subr.bf16.mxu1 %v5612_v13  ;;  %v5644_v12 = vld [vmem:[%s5926_s29 + $0x368] sm:$0xff]  }
 0x360   :  { %5160 = vmatprep.subr.bf16.mxu0 %v5613_v16  ;;  %v5645_v13 = vld [vmem:[%s5926_s29 + $0x3e8] sm:$0xff]  }
 0x361   :  { %v5646_v16 = vld [vmem:[%s5926_s29 + $0x328] sm:$0xff]  }
 0x362   :  { %5139 = vmatpush3.bf16.msra.mxu1 %v5614_v17  ;;  %v328_v17 = vrot.slane %v6197_v57, %v6204_v63  ;;  %v5654_v57 = vld [vmem:[%s5926_s29 + $0x338] sm:$0xff]  }
 0x363   :  { %5161 = vmatpush3.bf16.msra.mxu0 %v5615_v19  ;;  %5140 = vmatprep.subr.bf16.mxu1 %v5616_v20  ;;  %v5648_v19 = vld [vmem:[%s5926_s29 + $0x370] sm:$0xff]  }
 0x364   :  { %5162 = vmatprep.subr.bf16.mxu0 %v5617_v22  ;;  %v5649_v20 = vld [vmem:[%s5926_s29 + $0x3f0] sm:$0xff]   ;;  %v721_v22 = vadd.f32 %v6208_v2, %v328_v17 }
 0x366   :  { %5141 = vmatpush3.bf16.msra.mxu1 %v5618_v24  ;;  %v5653_v24 = vld [vmem:[%s5926_s29 + $0x3f8] sm:$0xff]   ;;  %v780_v25 = vmax.f32 %v721_v22, 0.0 }
 0x367   :  { %5163 = vmatpush3.bf16.msra.mxu0 %v5619_v26  ;;  %5142 = vmatprep.subr.bf16.mxu1 %v5620_v27  ;;  %v5655_v26 = vld [vmem:[%s5926_s29 + $0x3b8] sm:$0xff]   ;;  %v782_v27 = vmax.f32 %v6210_v5, 0.0  ;;  %s6653_s29 = sld [smem:[#allocation12_spill]] }
 0x368   :  { %5164 = vmatprep.subr.bf16.mxu0 %v5621_v30  ;;  %v796_v29 = vpack.c.bf16 %v780_v25, %v780_v25 }
 0x369   :  { %v798_v2 = vpack.c.bf16 %v782_v27, %v782_v27 }
 0x36a   :  { %5143 = vmatpush3.bf16.msra.mxu1 %v5622_v33 }
 0x36b   :  { %5165 = vmatpush3.bf16.msra.mxu0 %v5623_v43  ;;  %5172 = vmatprep.subr.bf16.mxu1 %v5624_v15 }
 0x36c   :  { %5194 = vmatprep.subr.bf16.mxu0 %v5625_v44 }
 0x36d   :  { %2024 = vmatmul.mubr.bf16.vlgmr.msra.gmra.mrb[24].mxu1 %v792_v45 }
 0x36e   :  { %2064 = vmatmul.mubr.bf16.vlgmr.msra.gmra.mrb[28].mxu0 %v794_v47  ;;  %5173 = vmatpush3.bf16.msra.mxu1 %v5626_v7 }
 0x36f   :  { %2103 = vmatprep.mubr.bf16.mxu1 %v797_v49  ;;  %5195 = vmatpush3.bf16.msra.mxu0 %v5627_v8 }
 0x370   :  { %2143 = vmatprep.mubr.bf16.mxu0 %v799_v51  ;;  %5174 = vmatprep.subr.bf16.mxu1 %v5628_v48 }
 0x371   :  { %5196 = vmatprep.subr.bf16.mxu0 %v5629_v50 }
 0x372   :  { %5175 = vmatpush3.bf16.msra.mxu1 %v5630_v53 }
 0x373   :  { %5197 = vmatpush3.bf16.msra.mxu0 %v5631_v54  ;;  %5176 = vmatprep.subr.bf16.mxu1 %v5632_v55 }
 0x374   :  { %5198 = vmatprep.subr.bf16.mxu0 %v5633_v56 }
 0x376   :  { %5177 = vmatpush3.bf16.msra.mxu1 %v5634_v60 }
 0x377   :  { %5199 = vmatpush3.bf16.msra.mxu0 %v5635_v61  ;;  %5178 = vmatprep.subr.bf16.mxu1 %v5636_v62 }
 0x378   :  { %5200 = vmatprep.subr.bf16.mxu0 %v5637_v0 }
 0x37a   :  { %5179 = vmatpush3.bf16.msra.mxu1 %v5638_v1 }
 0x37b   :  { %5201 = vmatpush3.bf16.msra.mxu0 %v5639_v3  ;;  %5180 = vmatprep.subr.bf16.mxu1 %v5640_v9 }
 0x37c   :  { %5202 = vmatprep.subr.bf16.mxu0 %v5641_v37 }
 0x37e   :  { %5181 = vmatpush3.bf16.msra.mxu1 %v5642_v10 }
 0x37f   :  { %5203 = vmatpush3.bf16.msra.mxu0 %v5643_v11  ;;  %5182 = vmatprep.subr.bf16.mxu1 %v5644_v12 }
 0x380   :  { %5204 = vmatprep.subr.bf16.mxu0 %v5645_v13 }
 0x382   :  { %5183 = vmatpush3.bf16.msra.mxu1 %v5646_v16 }
 0x383   :  { %5205 = vmatpush3.bf16.msra.mxu0 %v5647_v18  ;;  %5184 = vmatprep.subr.bf16.mxu1 %v5648_v19 }
 0x384   :  { %5206 = vmatprep.subr.bf16.mxu0 %v5649_v20 }
 0x386   :  { %5185 = vmatpush3.bf16.msra.mxu1 %v5650_v21 }
 0x387   :  { %5207 = vmatpush3.bf16.msra.mxu0 %v5651_v40  ;;  %5186 = vmatprep.subr.bf16.mxu1 %v5652_v23 }
 0x388   :  { %5208 = vmatprep.subr.bf16.mxu0 %v5653_v24 }
 0x38a   :  { %5187 = vmatpush3.bf16.msra.mxu1 %v5654_v57 }
 0x38b   :  { %5209 = vmatpush3.bf16.msra.mxu0 %v5655_v26  ;;  %5450 = vmatprep.subr.bf16.mxu1 %v5879_v4 }
 0x38d   :  { %2104 = vmatmul.mubr.bf16.vlgmr.msra.gmra.mrb[28].mxu1 %v796_v29 }
 0x38e   :  { %2144 = vmatmul.mubr.bf16.vlgmr.msra.gmra.mrb[32].mxu0 %v798_v2  ;;  %5418 = vmatprep.mubr.msk.f32.mxu1 %vm5880_vm0, %v5881_v6 }
 0x38f   :  { %2509 = vmatprep.mubr.bf16.mxu0 %v5882_v28 }
 0x400   :  { %v5056_v30 = vpop.f32.mrb[16].mxu1  ;;  %v5078_v31 = vpop.f32.mrb[20].mxu0 }
 0x401   :  { %v5057_v33 = vpop.f32.mrb[17].mxu1  ;;  %v5079_v14 = vpop.f32.mrb[21].mxu0 }
 0x402   :  { %v5058_v5 = vadd.f32 %v5057_v33, %v5056_v30  ;;  %v5080_v43 = vadd.f32 %v5079_v14, %v5078_v31  ;;  %v5059_v15 = vpop.f32.mrb[18].mxu1  ;;  %v5081_v34 = vpop.f32.mrb[22].mxu0  ;;  %v2181_v14 = vld [vmem:[%s5956_s30] sm:$0xff] }
 0x403   :  { %v5060_v44 = vpop.f32.mrb[19].mxu1  ;;  %v5082_v35 = vpop.f32.mrb[23].mxu0 }
 0x404   :  { %v1866_v36 = vadd.f32 %v5058_v5, %v4736_v32  ;;  %v2182_v5 = vld [vmem:[%s5956_s30 + $0x8] sm:$0xff]  ;;  %v4865_v35 = vld [vmem:[%s5946_s19] ss:$0 sm:$0xff]  ;;  %s5883_s19 = smov 64   ;;  %s6658_s30 = sld [smem:[#allocation18_spill]] }
 0x406   :  { %v1906_v7 = vadd.f32 %v5080_v43, %v1866_v36  ;;  %v5451_v43 = vpack.c.bf16 %v2182_v5, %v2181_v14 }
 0x408   :  { %5452 = vmatpush3.bf16.msra.mxu1 %v5451_v43  ;;  %v2300_v43 = vld [vmem:[%s6646_s0 + $0x30] sm:$0xff] }
 0x420   :  { %v5100_v45 = vpop.f32.mrb[20].mxu1  ;;  %v5122_v8 = vpop.f32.mrb[24].mxu0 }
 0x421   :  { %v5101_v47 = vpop.f32.mrb[21].mxu1  ;;  %v5123_v48 = vpop.f32.mrb[25].mxu0 }
 0x422   :  { %v5102_v49 = vadd.f32 %v5101_v47, %v5100_v45  ;;  %v5124_v50 = vadd.f32 %v5123_v48, %v5122_v8  ;;  %v5103_v51 = vpop.f32.mrb[22].mxu1  ;;  %v5125_v53 = vpop.f32.mrb[26].mxu0  ;;  %v4867_v47 = vld [vmem:[%s5961_s6] ss:$0 sm:$0xff]  ;;  %s5884_s6 = smov 80  }
 0x423   :  { %v5104_v54 = vpop.f32.mrb[23].mxu1  ;;  %v5126_v55 = vpop.f32.mrb[27].mxu0 }
 0x424   :  { %v1946_v56 = vadd.f32 %v5102_v49, %v1906_v7  ;;  %v4866_v7 = vld [vmem:[%s5951_s24] ss:$0 sm:$0xff]  ;;  %s6657_s24 = sld [smem:[#allocation17_spill]] }
 0x426   :  { %v1986_v60 = vadd.f32 %v5124_v50, %v1946_v56 }
 0x440   :  { %v5144_v61 = vpop.f32.mrb[24].mxu1 }
 0x441   :  { %v5166_v62 = vpop.f32.mrb[28].mxu0  ;;  %v5145_v0 = vpop.f32.mrb[25].mxu1 }
 0x442   :  { %v5146_v1 = vadd.f32 %v5145_v0, %v5144_v61  ;;  %v5167_v3 = vpop.f32.mrb[29].mxu0  ;;  %v5147_v9 = vpop.f32.mrb[26].mxu1  ;;  %v2302_v0 = vld [vmem:[%s6646_s0 + $0x40] sm:$0xff] }
 0x443   :  { %v5168_v37 = vadd.f32 %v5167_v3, %v5166_v62  ;;  %v5169_v10 = vpop.f32.mrb[30].mxu0  ;;  %v5148_v11 = vpop.f32.mrb[27].mxu1  ;;  %v2294_v62 = vld [vmem:[%s6646_s0] sm:$0xff]  ;;  %v2303_v9 = vld [vmem:[%s6646_s0 + $0x48] sm:$0xff] }
 0x444   :  { %v2026_v12 = vadd.f32 %v5146_v1, %v1986_v60  ;;  %v5170_v13 = vpop.f32.mrb[31].mxu0  ;;  %v2295_v1 = vld [vmem:[%s6646_s0 + $0x8] sm:$0xff]  ;;  %v4872_v3 = vcombine.high %v2294_v62, %v2302_v0 }
 0x445   :  { %v4873_v10 = vcombine.low %v2295_v1, %v2303_v9  ;;  %v4874_v11 = vcombine.high %v2295_v1, %v2303_v9  ;;  %v2304_v13 = vld [vmem:[%s6646_s0 + $0x50] sm:$0xff]  ;;  %v5670_v1 = vld [vmem:[%s6649_s13 + $0x18] sm:$0xff]   ;;  %v5672_v9 = vld [vmem:[%s6649_s13 + $0x60] sm:$0xff]  }
 0x446   :  { %v2066_v16 = vadd.f32 %v5168_v37, %v2026_v12  ;;  %v4871_v37 = vcombine.low %v2294_v62, %v2302_v0  ;;  %2477 = vmatprep.subr.bf16.mxu0 %v4872_v3  ;;  %v2296_v12 = vld [vmem:[%s6646_s0 + $0x10] sm:$0xff]  ;;  %v5668_v62 = vld [vmem:[%s6649_s13 + $0x58] sm:$0xff]  }
 0x447   :  { %2518 = vmatprep.subr.bf16.mxu1 %v4874_v11  ;;  %v5669_v0 = vld [vmem:[%s6649_s13 + $0xd8] sm:$0xff]   ;;  %v5675_v11 = vld [vmem:[%s6649_s13 + $0xa0] sm:$0xff]  }
 0x448   :  { %2478 = vmatpush1.bf16.msra.mxu0 %v4871_v37  ;;  %v5671_v3 = vld [vmem:[%s6649_s13 + $0x98] sm:$0xff]   ;;  %v5673_v37 = vld [vmem:[%s6649_s13 + $0xe0] sm:$0xff]  }
 0x460   :  { %v5188_v17 = vpop.f32.mrb[28].mxu1 }
 0x461   :  { %v5210_v18 = vpop.f32.mrb[32].mxu0  ;;  %v5189_v19 = vpop.f32.mrb[29].mxu1 }
 0x462   :  { %v5190_v20 = vadd.f32 %v5189_v19, %v5188_v17  ;;  %v5211_v21 = vpop.f32.mrb[33].mxu0  ;;  %v5191_v22 = vpop.f32.mrb[30].mxu1  ;;  %v4875_v17 = vcombine.low %v2296_v12, %v2304_v13  ;;  %v2305_v19 = vld [vmem:[%s6646_s0 + $0x58] sm:$0xff] }
 0x463   :  { %v5212_v40 = vadd.f32 %v5211_v21, %v5210_v18  ;;  %v5213_v23 = vpop.f32.mrb[34].mxu0  ;;  %v5192_v24 = vpop.f32.mrb[31].mxu1  ;;  %v4876_v18 = vcombine.high %v2296_v12, %v2304_v13  ;;  %v5676_v12 = vld [vmem:[%s6649_s13 + $0x68] sm:$0xff]  }
 0x464   :  { %v2106_v57 = vadd.f32 %v5190_v20, %v2066_v16  ;;  %v5214_v25 = vpop.f32.mrb[35].mxu0  ;;  %v2297_v16 = vld [vmem:[%s6646_s0 + $0x18] sm:$0xff]  ;;  %v5677_v13 = vld [vmem:[%s6649_s13 + $0xe8] sm:$0xff]  }
 0x465   :  { %v4877_v20 = vcombine.low %v2297_v16, %v2305_v19  ;;  %v4878_v21 = vcombine.high %v2297_v16, %v2305_v19  ;;  %2559 = vmatprep.subr.bf16.mxu0 %v4876_v18  ;;  %v5678_v16 = vld [vmem:[%s6649_s13 + $0x28] sm:$0xff]   ;;  %v5680_v18 = vld [vmem:[%s6649_s13 + $0x70] sm:$0xff]  }
 0x466   :  { %v2146_v26 = vadd.f32 %v5212_v40, %v2106_v57  ;;  %v4869_v57 = vld [vmem:[%s6647_s5] ss:$0 sm:$0xff]  ;;  %v5681_v19 = vld [vmem:[%s6649_s13 + $0xf0] sm:$0xff]  }
 0x468   :  { %v2151_v27 = vadd.f32 %v2146_v26, %v6075_v46  ;;  %v4870_v26 = vld [vmem:[%s6648_s9] ss:$0 sm:$0xff] }
 0x46a   :  { %v2154_v29 = vsel %vm151_vm1, %v2151_v27, 0.0 }
 0x46b   :  { %2155 = vadd.xlane.f32.xlu1 %v2154_v29  ;;  %v2298_v29 = vld [vmem:[%s6646_s0 + $0x20] sm:$0xff] }
 0x4f8   :  { %v2156_v2 = vpop.xlane.xlu1 %2155 }
 0x4f9   :  { %v2157_v30 = vmul.f32 0.0625, %v2156_v2 }
 0x4fb   :  { %v2158_v31 = vsub.f32 %v2151_v27, %v2157_v30  ;;  %v2306_v30 = vld [vmem:[%s6646_s0 + $0x60] sm:$0xff] }
 0x4fc   :  { %v4880_v14 = vcombine.high %v2298_v29, %v2306_v30 }
 0x4fd   :  { %v2159_v32 = vmul.f32 %v2158_v31, %v2158_v31 }
 0x4ff   :  { %v2160_v33 = vsel %vm151_vm1, %v2159_v32, 0.0  ;;  %v2307_v32 = vld [vmem:[%s6646_s0 + $0x68] sm:$0xff] }
 0x500   :  { %2161 = vadd.xlane.f32.xlu1 %v2160_v33 }
 0x58d   :  { %v2162_v15 = vpop.xlane.xlu1 %2161 }
 0x58e   :  { %v2163_v34 = vmul.f32 0.0625, %v2162_v15  ;;  %v2308_v15 = vld [vmem:[%s6646_s0 + $0x70] sm:$0xff] }
 0x590   :  { %v2164_v46 = vadd.f32 1e-05, %v2163_v34  ;;  %v2301_v34 = vld [vmem:[%s6646_s0 + $0x38] sm:$0xff] }
 0x592   :  { %5786 = vrsqrt.f32 %v2164_v46  ;;  %v2309_v46 = vld [vmem:[%s6646_s0 + $0x78] sm:$0xff] }
 0x59c   :  { %v5787_v44 = vpop.eup %5786 }
 0x59d   :  { %v2166_v36 = vmul.f32 %v5787_v44, %v2158_v31  ;;  %v2299_v31 = vld [vmem:[%s6646_s0 + $0x28] sm:$0xff]  ;;  %v4879_v44 = vcombine.low %v2298_v29, %v2306_v30 }
 0x59e   :  { %v4882_v5 = vcombine.high %v2299_v31, %v2307_v32 }
 0x59f   :  { %v2173_v45 = vmul.f32 %v4865_v35, %v2166_v36  ;;  %v4881_v35 = vcombine.low %v2299_v31, %v2307_v32  ;;  %v4884_v36 = vcombine.high %v2300_v43, %v2308_v15 }
 0x5a1   :  { %v2180_v8 = vadd.f32 %v4866_v7, %v2173_v45  ;;  %v4886_v7 = vcombine.high %v2301_v34, %v2309_v46  ;;  %v4883_v45 = vcombine.low %v2300_v43, %v2308_v15 }
 0x5a3   :  { %5419 = vmatmul.mubr.msk.f32.vlgmr.msra.gmra.mrb[32].mxu1 %vm151_vm1, %v2180_v8 }
 0x5a4   :  { %2550 = vmatprep.mubr.bf16.mxu1 %v5882_v28  ;;  %2519 = vmatpush1.bf16.msra.mxu1 %v4873_v10  ;;  %v5674_v10 = vld [vmem:[%s6649_s13 + $0x20] sm:$0xff]  }
 0x5a5   :  { %2600 = vmatprep.subr.bf16.mxu1 %v4878_v21  ;;  %v5683_v21 = vld [vmem:[%s6649_s13 + $0xb0] sm:$0xff]  }
 0x676   :  { %v2259_v48 = vpop.f32.mrb[32].mxu1 }
 0x677   :  { %v2260_v49 = vadd.f32 %v4867_v47, %v2259_v48  ;;  %v5420_v50 = vpop.f32.mrb[33].mxu1  ;;  %v5656_v47 = vld [vmem:[%s6649_s13 + $0x40] sm:$0xff]  }
 0x678   :  { %v5657_v48 = vld [vmem:[%s6649_s13 + $0xc0] sm:$0xff]  }
 0x679   :  { %v2263_v51 = vadd.f32 %v2260_v49, %v2180_v8  ;;  %v4885_v8 = vcombine.low %v2301_v34, %v2309_v46  ;;  %v5658_v49 = vld [vmem:[%s6649_s13] sm:$0xff]  }
 0x67a   :  { %v5659_v50 = vld [vmem:[%s6649_s13 + $0x80] sm:$0xff]  }
 0x67b   :  { %v2266_v53 = vsel %vm151_vm1, %v2263_v51, 0.0 }
 0x67c   :  { %2267 = vadd.xlane.f32.xlu0 %v2266_v53  ;;  %v5661_v53 = vld [vmem:[%s6649_s13 + $0xc8] sm:$0xff]  }
 0x709   :  { %v2268_v54 = vpop.xlane.xlu0 %2267 }
 0x70a   :  { %v2269_v55 = vmul.f32 0.0625, %v2268_v54  ;;  %v5662_v54 = vld [vmem:[%s6649_s13 + $0x8] sm:$0xff]  }
 0x70c   :  { %v2270_v56 = vsub.f32 %v2263_v51, %v2269_v55  ;;  %v5660_v51 = vld [vmem:[%s6649_s13 + $0x48] sm:$0xff]   ;;  %v5664_v55 = vld [vmem:[%s6649_s13 + $0x50] sm:$0xff]  }
 0x70e   :  { %v2271_v60 = vmul.f32 %v2270_v56, %v2270_v56 }
 0x710   :  { %v2272_v61 = vsel %vm151_vm1, %v2271_v60, 0.0  ;;  %v5666_v60 = vld [vmem:[%s6649_s13 + $0x10] sm:$0xff]  }
 0x711   :  { %2273 = vadd.xlane.f32.xlu1 %v2272_v61  ;;  %v5667_v61 = vld [vmem:[%s6649_s13 + $0x90] sm:$0xff]  }
 0x79e   :  { %v2274_v22 = vpop.xlane.xlu1 %2273 }
 0x79f   :  { %v2275_v40 = vmul.f32 0.0625, %v2274_v22  ;;  %v5684_v22 = vld [vmem:[%s6649_s13 + $0x78] sm:$0xff]  }
 0x7a1   :  { %v2276_v23 = vadd.f32 1e-05, %v2275_v40  ;;  %v5685_v40 = vld [vmem:[%s6649_s13 + $0xf8] sm:$0xff]  }
 0x7a3   :  { %5788 = vrsqrt.f32 %v2276_v23  ;;  %v5686_v23 = vld [vmem:[%s6649_s13 + $0x38] sm:$0xff]  }
 0x7ad   :  { %v5789_v24 = vpop.eup %5788 }
 0x7ae   :  { %v2278_v25 = vmul.f32 %v5789_v24, %v2270_v56  ;;  %v5665_v56 = vld [vmem:[%s6649_s13 + $0xd0] sm:$0xff]   ;;  %v5687_v24 = vld [vmem:[%s6649_s13 + $0xb8] sm:$0xff]  }
 0x7b0   :  { %v2285_v27 = vmul.f32 %v4869_v57, %v2278_v25  ;;  %v5688_v57 = vld [vmem:[%s6649_s13 + $0x140] sm:$0xff]  }
 0x7b1   :  { %v5689_v25 = vld [vmem:[%s6649_s13 + $0x1c0] sm:$0xff]  }
 0x7b2   :  { %v6344_v2 = vadd.f32 %v4870_v26, %v2285_v27  ;;  %v6404_v26 = vld [vmem:[%s6650_s17] sm:$0xff] }
 0x7b3   :  { %v2317_v27 = vrot.slane %v6404_v26, %v6137_v38  ;;  %v2325_v29 = vrot.slane %v6404_v26, %v6140_v39  ;;  %v2321_v30 = vrot.slane %v6404_v26, %v6146_v41  ;;  %v2329_v31 = vrot.slane %v6404_v26, %v6149_v42 }
 0x7b4   :  { %v2293_v33 = vpack.c.bf16 %v6344_v2, %v6344_v2 }
 0x7b6   :  { %4887 = vmatmul.mubr.msk.bf16.vlgmr.msra.gmra.mrb[36].mxu0 %vm151_vm1, %v2293_v33  ;;  %4888 = vmatmul.mubr.msk.bf16.vlgmr.msra.gmra.mrb[36].mxu1 %vm151_vm1, %v2293_v33 }
 0x7b7   :  { %2560 = vmatpush1.bf16.msra.mxu0 %v4875_v17  ;;  %2601 = vmatpush1.bf16.msra.mxu1 %v4877_v20  ;;  %v5679_v17 = vld [vmem:[%s6649_s13 + $0xa8] sm:$0xff]   ;;  %v5682_v20 = vld [vmem:[%s6649_s13 + $0x30] sm:$0xff]  }
 0x7b8   :  { %2591 = vmatprep.mubr.bf16.mxu0 %v5882_v28  ;;  %2632 = vmatprep.mubr.bf16.mxu1 %v5882_v28 }
 0x7b9   :  { %2641 = vmatprep.subr.bf16.mxu0 %v4880_v14  ;;  %2682 = vmatprep.subr.bf16.mxu1 %v4882_v5 }
 0x7be   :  { %4889 = vmatmul.mubr.msk.bf16.vlgmr.msra.gmra.mrb[40].mxu0 %vm151_vm1, %v2293_v33  ;;  %4890 = vmatmul.mubr.msk.bf16.vlgmr.msra.gmra.mrb[40].mxu1 %vm151_vm1, %v2293_v33 }
 0x7bf   :  { %2642 = vmatpush1.bf16.msra.mxu0 %v4879_v44  ;;  %2683 = vmatpush1.bf16.msra.mxu1 %v4881_v35 }
 0x7c0   :  { %2673 = vmatprep.mubr.bf16.mxu0 %v5882_v28  ;;  %2714 = vmatprep.mubr.bf16.mxu1 %v5882_v28 }
 0x7c1   :  { %2723 = vmatprep.subr.bf16.mxu0 %v4884_v36  ;;  %2764 = vmatprep.subr.bf16.mxu1 %v4886_v7 }
 0x7c6   :  { %4891 = vmatmul.mubr.msk.bf16.vlgmr.msra.gmra.mrb[44].mxu0 %vm151_vm1, %v2293_v33  ;;  %4892 = vmatmul.mubr.msk.bf16.vlgmr.msra.gmra.mrb[44].mxu1 %vm151_vm1, %v2293_v33 }
 0x7c7   :  { %2724 = vmatpush1.bf16.msra.mxu0 %v4883_v45  ;;  %2765 = vmatpush1.bf16.msra.mxu1 %v4885_v8 }
 0x7c8   :  { %2755 = vmatprep.mubr.bf16.mxu0 %v5882_v28  ;;  %2796 = vmatprep.mubr.bf16.mxu1 %v5882_v28  ;;  %v5663_v28 = vld [vmem:[%s6649_s13 + $0x88] sm:$0xff]  }
 0x7c9   :  { %5219 = vmatprep.subr.bf16.mxu0 %v5656_v47  ;;  %5241 = vmatprep.subr.bf16.mxu1 %v5657_v48 }
 0x7ce   :  { %4893 = vmatmul.mubr.msk.bf16.vlgmr.msra.gmra.mrb[48].mxu0 %vm151_vm1, %v2293_v33  ;;  %4894 = vmatmul.mubr.msk.bf16.vlgmr.msra.gmra.mrb[48].mxu1 %vm151_vm1, %v2293_v33 }
 0x7cf   :  { %5220 = vmatpush3.bf16.msra.mxu0 %v5658_v49  ;;  %5242 = vmatpush3.bf16.msra.mxu1 %v5659_v50 }
 0x7d0   :  { %5221 = vmatprep.subr.bf16.mxu0 %v5660_v51  ;;  %5243 = vmatprep.subr.bf16.mxu1 %v5661_v53  ;;  %v2337_v51 = vrot.slane %v6404_v26, %v6160_v58  ;;  %v2345_v53 = vrot.slane %v6404_v26, %v6163_v59 }
 0x7d3   :  { %5222 = vmatpush3.bf16.msra.mxu0 %v5662_v54  ;;  %5244 = vmatpush3.bf16.msra.mxu1 %v5663_v28  ;;  %v5690_v54 = vld [vmem:[%s6649_s13 + $0x100] sm:$0xff]  }
 0x7d4   :  { %5223 = vmatprep.subr.bf16.mxu0 %v5664_v55  ;;  %5245 = vmatprep.subr.bf16.mxu1 %v5665_v56  ;;  %v5691_v28 = vld [vmem:[%s6649_s13 + $0x180] sm:$0xff]  }
 0x7d7   :  { %5224 = vmatpush3.bf16.msra.mxu0 %v5666_v60  ;;  %5246 = vmatpush3.bf16.msra.mxu1 %v5667_v61  ;;  %v5692_v60 = vld [vmem:[%s6649_s13 + $0x148] sm:$0xff]  }
 0x7d8   :  { %5225 = vmatprep.subr.bf16.mxu0 %v5668_v62  ;;  %5247 = vmatprep.subr.bf16.mxu1 %v5669_v0  ;;  %v5693_v61 = vld [vmem:[%s6649_s13 + $0x1c8] sm:$0xff]  }
 0x7db   :  { %5226 = vmatpush3.bf16.msra.mxu0 %v5670_v1  ;;  %5248 = vmatpush3.bf16.msra.mxu1 %v5671_v3 }
 0x7dc   :  { %5227 = vmatprep.subr.bf16.mxu0 %v5672_v9  ;;  %5249 = vmatprep.subr.bf16.mxu1 %v5673_v37 }
 0x7df   :  { %5228 = vmatpush3.bf16.msra.mxu0 %v5674_v10  ;;  %5250 = vmatpush3.bf16.msra.mxu1 %v5675_v11 }
 0x7e0   :  { %5229 = vmatprep.subr.bf16.mxu0 %v5676_v12  ;;  %5251 = vmatprep.subr.bf16.mxu1 %v5677_v13  ;;  %v5694_v12 = vld [vmem:[%s6649_s13 + $0x108] sm:$0xff]  }
 0x7e1   :  { %v5695_v13 = vld [vmem:[%s6649_s13 + $0x188] sm:$0xff]  }
 0x7e3   :  { %5230 = vmatpush3.bf16.msra.mxu0 %v5678_v16  ;;  %5252 = vmatpush3.bf16.msra.mxu1 %v5679_v17 }
 0x7e4   :  { %5231 = vmatprep.subr.bf16.mxu0 %v5680_v18  ;;  %5253 = vmatprep.subr.bf16.mxu1 %v5681_v19  ;;  %v5696_v18 = vld [vmem:[%s6649_s13 + $0x150] sm:$0xff]  }
 0x7e5   :  { %v5697_v19 = vld [vmem:[%s6649_s13 + $0x1d0] sm:$0xff]  }
 0x7e7   :  { %5232 = vmatpush3.bf16.msra.mxu0 %v5682_v20  ;;  %5254 = vmatpush3.bf16.msra.mxu1 %v5683_v21 }
 0x7e8   :  { %5233 = vmatprep.subr.bf16.mxu0 %v5684_v22  ;;  %5255 = vmatprep.subr.bf16.mxu1 %v5685_v40 }
 0x7eb   :  { %5234 = vmatpush3.bf16.msra.mxu0 %v5686_v23  ;;  %5256 = vmatpush3.bf16.msra.mxu1 %v5687_v24  ;;  %v5698_v23 = vld [vmem:[%s6649_s13 + $0x110] sm:$0xff]  }
 0x7ec   :  { %5263 = vmatprep.subr.bf16.mxu0 %v5688_v57  ;;  %5285 = vmatprep.subr.bf16.mxu1 %v5689_v25  ;;  %v5699_v24 = vld [vmem:[%s6649_s13 + $0x190] sm:$0xff]   ;;  %v5700_v57 = vld [vmem:[%s6649_s13 + $0x158] sm:$0xff]  }
 0x7ed   :  { %v5701_v25 = vld [vmem:[%s6649_s13 + $0x1d8] sm:$0xff]  }
 0x889   :  { %v2511_v32 = vpop.f32.mrb[36].mxu0  ;;  %v2552_v33 = vpop.f32.mrb[36].mxu1 }
 0x88a   :  { %v2512_v14 = vadd.f32 %v2511_v32, %v2317_v27  ;;  %v2553_v5 = vadd.f32 %v2552_v33, %v2325_v29  ;;  %v2513_v43 = vpop.f32.mrb[37].mxu0  ;;  %v2554_v15 = vpop.f32.mrb[37].mxu1 }
 0x88b   :  { %v2514_v34 = vadd.f32 %v2513_v43, %v2321_v30  ;;  %v2555_v46 = vadd.f32 %v2554_v15, %v2329_v31  ;;  %v2515_v44 = vpop.f32.mrb[38].mxu0  ;;  %v2556_v35 = vpop.f32.mrb[38].mxu1 }
 0x88c   :  { %v2805_v36 = vmax.f32 %v2512_v14, 0.0  ;;  %v2807_v7 = vmax.f32 %v2553_v5, 0.0  ;;  %v2516_v45 = vpop.f32.mrb[39].mxu0  ;;  %v2557_v8 = vpop.f32.mrb[39].mxu1  ;;  %v5702_v14 = vld [vmem:[%s6649_s13 + $0x118] sm:$0xff]   ;;  %v6443_v44 = vld [vmem:[%s6650_s17 + $0x8] sm:$0xff] }
 0x88d   :  { %v2806_v47 = vmax.f32 %v2514_v34, 0.0  ;;  %v2808_v48 = vmax.f32 %v2555_v46, 0.0  ;;  %v5703_v5 = vld [vmem:[%s6649_s13 + $0x198] sm:$0xff]   ;;  %v5704_v34 = vld [vmem:[%s6649_s13 + $0x160] sm:$0xff]   ;;  %v2373_v35 = vrot.slane %v6443_v44, %v6192_v52  ;;  %v5708_v45 = vld [vmem:[%s6649_s13 + $0x168] sm:$0xff]  }
 0x88e   :  { %v2821_v55 = vpack.c.bf16 %v2805_v36, %v2805_v36  ;;  %v2823_v56 = vpack.c.bf16 %v2807_v7, %v2807_v7  ;;  %v5705_v46 = vld [vmem:[%s6649_s13 + $0x1e0] sm:$0xff]   ;;  %v5709_v8 = vld [vmem:[%s6649_s13 + $0x1e8] sm:$0xff]  }
 0x88f   :  { %v2822_v49 = vpack.c.bf16 %v2806_v47, %v2806_v47  ;;  %v2824_v50 = vpack.c.bf16 %v2808_v48, %v2808_v48  ;;  %v5706_v36 = vld [vmem:[%s6649_s13 + $0x120] sm:$0xff]  }
 0x890   :  { %v5707_v7 = vld [vmem:[%s6649_s13 + $0x1a0] sm:$0xff]  }
 0x891   :  { %v6422_v62 = vpop.f32.mrb[40].mxu0  ;;  %v6424_v0 = vpop.f32.mrb[40].mxu1  ;;  %3900 = vmatprep.mubr.bf16.mxu0 %v2822_v49  ;;  %3940 = vmatprep.mubr.bf16.mxu1 %v2824_v50 }
 0x892   :  { %v2595_v1 = vpop.f32.mrb[41].mxu0  ;;  %v2636_v3 = vpop.f32.mrb[41].mxu1  ;;  %3901 = vmatmul.mubr.bf16.vlgmr.msra.gmra.mrb[52].mxu0 %v2821_v55  ;;  %3941 = vmatmul.mubr.bf16.vlgmr.msra.gmra.mrb[52].mxu1 %v2823_v56  ;;  %v5711_v55 = vld [vmem:[%s6649_s13 + $0x1a8] sm:$0xff]   ;;  %v2333_v56 = vrot.slane %v6404_v26, %v6204_v63 }
 0x893   :  { %v2596_v9 = vadd.f32 %v2595_v1, %v2337_v51  ;;  %v2637_v37 = vadd.f32 %v2636_v3, %v2345_v53  ;;  %5264 = vmatpush3.bf16.msra.mxu0 %v5690_v54  ;;  %5286 = vmatpush3.bf16.msra.mxu1 %v5691_v28  ;;  %v2597_v10 = vpop.f32.mrb[42].mxu0  ;;  %v2638_v11 = vpop.f32.mrb[42].mxu1  ;;  %v5710_v28 = vld [vmem:[%s6649_s13 + $0x128] sm:$0xff]   ;;  %v5712_v3 = vld [vmem:[%s6649_s13 + $0x170] sm:$0xff]  }
 0x894   :  { %v2598_v16 = vpop.f32.mrb[43].mxu0  ;;  %v2639_v17 = vpop.f32.mrb[43].mxu1  ;;  %5265 = vmatprep.subr.bf16.mxu0 %v5692_v60  ;;  %5287 = vmatprep.subr.bf16.mxu1 %v5693_v61  ;;  %v2341_v60 = vrot.slane %v6404_v26, %v6192_v52  ;;  %v2361_v10 = vrot.slane %v6443_v44, %v6149_v42  ;;  %v5714_v11 = vld [vmem:[%s6649_s13 + $0x130] sm:$0xff]   ;;  %v2594_v26 = vadd.f32 %v6422_v62, %v2333_v56  ;;  %v5718_v42 = vld [vmem:[%s6649_s13 + $0x138] sm:$0xff]   ;;  %v5720_v62 = vld [vmem:[%s6649_s13 + $0x240] sm:$0xff]  }
 0x895   :  { %v2810_v20 = vmax.f32 %v2596_v9, 0.0  ;;  %v2812_v21 = vmax.f32 %v2637_v37, 0.0  ;;  %v5713_v9 = vld [vmem:[%s6649_s13 + $0x1f0] sm:$0xff]   ;;  %v2353_v37 = vrot.slane %v6443_v44, %v6146_v41  ;;  %v5717_v16 = vld [vmem:[%s6649_s13 + $0x1f8] sm:$0xff]   ;;  %v5742_v56 = vld [vmem:[%s6649_s13 + $0x228] sm:$0xff]  }
 0x896   :  { %v5715_v52 = vld [vmem:[%s6649_s13 + $0x1b0] sm:$0xff]  }
 0x897   :  { %v2826_v22 = vpack.c.bf16 %v2810_v20, %v2810_v20  ;;  %v2828_v40 = vpack.c.bf16 %v2812_v21, %v2812_v21  ;;  %5266 = vmatpush3.bf16.msra.mxu0 %v5694_v12  ;;  %5288 = vmatpush3.bf16.msra.mxu1 %v5695_v13  ;;  %v2635_v12 = vadd.f32 %v6424_v0, %v2341_v60  ;;  %v5716_v13 = vld [vmem:[%s6649_s13 + $0x178] sm:$0xff]   ;;  %v2809_v20 = vmax.f32 %v2594_v26, 0.0  ;;  %v5721_v0 = vld [vmem:[%s6649_s13 + $0x2c0] sm:$0xff]   ;;  %v5747_v26 = vld [vmem:[%s6649_s13 + $0x2b0] sm:$0xff]  }
 0x898   :  { %5267 = vmatprep.subr.bf16.mxu0 %v5696_v18  ;;  %5289 = vmatprep.subr.bf16.mxu1 %v5697_v19  ;;  %v5719_v19 = vld [vmem:[%s6649_s13 + $0x1b8] sm:$0xff]   ;;  %v2349_v60 = vrot.slane %v6443_v44, %v6137_v38 }
 0x899   :  { %v6434_v27 = vpop.f32.mrb[44].mxu0  ;;  %v6436_v29 = vpop.f32.mrb[44].mxu1  ;;  %3980 = vmatprep.mubr.bf16.mxu0 %v2826_v22  ;;  %4020 = vmatprep.mubr.bf16.mxu1 %v2828_v40  ;;  %v2811_v21 = vmax.f32 %v2635_v12, 0.0 }
 0x89a   :  { %v2677_v30 = vpop.f32.mrb[45].mxu0  ;;  %v2718_v31 = vpop.f32.mrb[45].mxu1 }
 0x89b   :  { %5268 = vmatpush3.bf16.msra.mxu0 %v5698_v23  ;;  %5290 = vmatpush3.bf16.msra.mxu1 %v5699_v24  ;;  %v2679_v32 = vpop.f32.mrb[46].mxu0  ;;  %v2720_v33 = vpop.f32.mrb[46].mxu1  ;;  %v2678_v17 = vadd.f32 %v2677_v30, %v2353_v37  ;;  %v2719_v18 = vadd.f32 %v2718_v31, %v2361_v10  ;;  %v5722_v23 = vld [vmem:[%s6649_s13 + $0x200] sm:$0xff]   ;;  %v2825_v24 = vpack.c.bf16 %v2809_v20, %v2809_v20  ;;  %v5724_v31 = vld [vmem:[%s6649_s13 + $0x248] sm:$0xff]  }
 0x89c   :  { %v2680_v43 = vpop.f32.mrb[47].mxu0  ;;  %v2721_v15 = vpop.f32.mrb[47].mxu1  ;;  %5269 = vmatprep.subr.bf16.mxu0 %v5700_v57  ;;  %5291 = vmatprep.subr.bf16.mxu1 %v5701_v25  ;;  %v2827_v57 = vpack.c.bf16 %v2811_v21, %v2811_v21  ;;  %v5723_v25 = vld [vmem:[%s6649_s13 + $0x280] sm:$0xff]   ;;  %v5725_v32 = vld [vmem:[%s6649_s13 + $0x2c8] sm:$0xff]   ;;  %v2369_v37 = vrot.slane %v6443_v44, %v6160_v58  ;;  %v2377_v10 = vrot.slane %v6443_v44, %v6163_v59 }
 0x89d   :  { %v2814_v22 = vmax.f32 %v2678_v17, 0.0  ;;  %v2816_v40 = vmax.f32 %v2719_v18, 0.0  ;;  %v5728_v43 = vld [vmem:[%s6649_s13 + $0x250] sm:$0xff]   ;;  %v5752_v18 = vld [vmem:[%s6649_s13 + $0x340] sm:$0xff]  }
 0x89e   :  { %v5729_v15 = vld [vmem:[%s6649_s13 + $0x2d0] sm:$0xff]  }
 0x89f   :  { %5270 = vmatpush3.bf16.msra.mxu0 %v5702_v14  ;;  %5292 = vmatpush3.bf16.msra.mxu1 %v5703_v5  ;;  %v2830_v30 = vpack.c.bf16 %v2814_v22, %v2814_v22  ;;  %v2832_v33 = vpack.c.bf16 %v2816_v40, %v2816_v40  ;;  %v5726_v14 = vld [vmem:[%s6649_s13 + $0x208] sm:$0xff]  }
 0x8a0   :  { %5271 = vmatprep.subr.bf16.mxu0 %v5704_v34  ;;  %5293 = vmatprep.subr.bf16.mxu1 %v5705_v46  ;;  %v5727_v5 = vld [vmem:[%s6649_s13 + $0x288] sm:$0xff]   ;;  %v5730_v34 = vld [vmem:[%s6649_s13 + $0x210] sm:$0xff]  }
 0x8a1   :  { %v6451_v47 = vpop.f32.mrb[48].mxu0  ;;  %v2798_v48 = vpop.f32.mrb[48].mxu1  ;;  %v5731_v46 = vld [vmem:[%s6649_s13 + $0x290] sm:$0xff]   ;;  %v5757_v40 = vld [vmem:[%s6649_s13 + $0x3c8] sm:$0xff]  }
 0x8a2   :  { %v6453_v49 = vadd.f32 %v2798_v48, %v2373_v35  ;;  %v6455_v50 = vpop.f32.mrb[49].mxu0  ;;  %v6457_v51 = vpop.f32.mrb[49].mxu1  ;;  %v5732_v35 = vld [vmem:[%s6649_s13 + $0x258] sm:$0xff]   ;;  %v5737_v48 = vld [vmem:[%s6649_s13 + $0x2e0] sm:$0xff]  }
 0x8a3   :  { %5272 = vmatpush3.bf16.msra.mxu0 %v5706_v36  ;;  %5294 = vmatpush3.bf16.msra.mxu1 %v5707_v7  ;;  %v2761_v53 = vpop.f32.mrb[50].mxu0  ;;  %v2802_v54 = vpop.f32.mrb[50].mxu1  ;;  %v5733_v36 = vld [vmem:[%s6649_s13 + $0x2d8] sm:$0xff]   ;;  %v2760_v58 = vadd.f32 %v6455_v50, %v2369_v37  ;;  %v2801_v59 = vadd.f32 %v6457_v51, %v2377_v10  ;;  %v5754_v50 = vld [vmem:[%s6649_s13 + $0x300] sm:$0xff]  }
 0x8a4   :  { %v2762_v61 = vpop.f32.mrb[51].mxu0  ;;  %v2803_v1 = vpop.f32.mrb[51].mxu1  ;;  %5273 = vmatprep.subr.bf16.mxu0 %v5708_v45  ;;  %5295 = vmatprep.subr.bf16.mxu1 %v5709_v8  ;;  %v5734_v7 = vld [vmem:[%s6649_s13 + $0x218] sm:$0xff]   ;;  %v5736_v8 = vld [vmem:[%s6649_s13 + $0x260] sm:$0xff]  }
 0x8a5   :  { %v5735_v45 = vld [vmem:[%s6649_s13 + $0x298] sm:$0xff]   ;;  %v5738_v53 = vld [vmem:[%s6649_s13 + $0x220] sm:$0xff]   ;;  %v5743_v61 = vld [vmem:[%s6649_s13 + $0x2a8] sm:$0xff]   ;;  %v2820_v20 = vmax.f32 %v2801_v59, 0.0 }
 0x8a6   :  { %v5739_v54 = vld [vmem:[%s6649_s13 + $0x2a0] sm:$0xff]   ;;  %v5744_v1 = vld [vmem:[%s6649_s13 + $0x270] sm:$0xff]  }
 0x8a7   :  { %5274 = vmatpush3.bf16.msra.mxu0 %v5710_v28  ;;  %5296 = vmatpush3.bf16.msra.mxu1 %v5711_v55  ;;  %v5740_v28 = vld [vmem:[%s6649_s13 + $0x268] sm:$0xff]   ;;  %v5755_v51 = vld [vmem:[%s6649_s13 + $0x380] sm:$0xff]  }
 0x8a8   :  { %5275 = vmatprep.subr.bf16.mxu0 %v5712_v3  ;;  %5297 = vmatprep.subr.bf16.mxu1 %v5713_v9  ;;  %v5741_v55 = vld [vmem:[%s6649_s13 + $0x2e8] sm:$0xff]   ;;  %v2357_v3 = vrot.slane %v6443_v44, %v6140_v39  ;;  %v5745_v9 = vld [vmem:[%s6649_s13 + $0x2f0] sm:$0xff]   ;;  %v5748_v39 = vld [vmem:[%s6649_s13 + $0x278] sm:$0xff]  }
 0x8aa   :  { %v2717_v12 = vadd.f32 %v6436_v29, %v2357_v3  ;;  %v5753_v29 = vld [vmem:[%s6649_s13 + $0x3c0] sm:$0xff]   ;;  %v2819_v3 = vmax.f32 %v6453_v49, 0.0 }
 0x8ab   :  { %5276 = vmatpush3.bf16.msra.mxu0 %v5714_v11  ;;  %5298 = vmatpush3.bf16.msra.mxu1 %v5715_v52  ;;  %v5746_v11 = vld [vmem:[%s6649_s13 + $0x230] sm:$0xff]   ;;  %v2676_v52 = vadd.f32 %v6434_v27, %v2349_v60  ;;  %v5751_v27 = vld [vmem:[%s6649_s13 + $0x2b8] sm:$0xff]  }
 0x8ac   :  { %5277 = vmatprep.subr.bf16.mxu0 %v5716_v13  ;;  %5299 = vmatprep.subr.bf16.mxu1 %v5717_v16  ;;  %v5749_v13 = vld [vmem:[%s6649_s13 + $0x2f8] sm:$0xff]  }
 0x8ad   :  { %v5750_v16 = vld [vmem:[%s6649_s13 + $0x238] sm:$0xff]   ;;  %v2813_v17 = vmax.f32 %v2676_v52, 0.0 }
 0x8ae   :  { %v5780_v60 = vld [vmem:[%s6649_s13 + $0x378] sm:$0xff]  }
 0x8af   :  { %5278 = vmatpush3.bf16.msra.mxu0 %v5718_v42  ;;  %5300 = vmatpush3.bf16.msra.mxu1 %v5719_v19  ;;  %v2815_v42 = vmax.f32 %v2717_v12, 0.0  ;;  %v2818_v19 = vmax.f32 %v2760_v58, 0.0  ;;  %v2829_v21 = vpack.c.bf16 %v2813_v17, %v2813_v17 }
 0x8b0   :  { %5307 = vmatprep.subr.bf16.mxu0 %v5720_v62  ;;  %5329 = vmatprep.subr.bf16.mxu1 %v5721_v0  ;;  %v5756_v0 = vld [vmem:[%s6649_s13 + $0x348] sm:$0xff]  }
 0x8b1   :  { %v2831_v62 = vpack.c.bf16 %v2815_v42, %v2815_v42  ;;  %v2834_v22 = vpack.c.bf16 %v2818_v19, %v2818_v19 }
 0x8b2   :  { %3981 = vmatmul.mubr.bf16.vlgmr.msra.gmra.mrb[56].mxu0 %v2825_v24  ;;  %4021 = vmatmul.mubr.bf16.vlgmr.msra.gmra.mrb[56].mxu1 %v2827_v57  ;;  %v5758_v24 = vld [vmem:[%s6649_s13 + $0x308] sm:$0xff]  }
 0x8b3   :  { %5308 = vmatpush3.bf16.msra.mxu0 %v5722_v23  ;;  %4060 = vmatprep.mubr.bf16.mxu0 %v2830_v30  ;;  %v2836_v23 = vpack.c.bf16 %v2820_v20, %v2820_v20  ;;  %v5759_v57 = vld [vmem:[%s6649_s13 + $0x388] sm:$0xff]   ;;  %v5761_v30 = vld [vmem:[%s6649_s13 + $0x3d0] sm:$0xff]  }
 0x8b4   :  { %5330 = vmatpush3.bf16.msra.mxu1 %v5723_v25  ;;  %4100 = vmatprep.mubr.bf16.mxu1 %v2832_v33  ;;  %v5760_v25 = vld [vmem:[%s6649_s13 + $0x350] sm:$0xff]   ;;  %v5764_v33 = vld [vmem:[%s6649_s13 + $0x358] sm:$0xff]  }
 0x8b5   :  { %5309 = vmatprep.subr.bf16.mxu0 %v5724_v31  ;;  %5331 = vmatprep.subr.bf16.mxu1 %v5725_v32  ;;  %v5762_v31 = vld [vmem:[%s6649_s13 + $0x310] sm:$0xff]  }
 0x8b6   :  { %v5763_v32 = vld [vmem:[%s6649_s13 + $0x390] sm:$0xff]  }
 0x8b7   :  { %5310 = vmatpush3.bf16.msra.mxu0 %v5726_v14  ;;  %v5765_v14 = vld [vmem:[%s6649_s13 + $0x3d8] sm:$0xff]  }
 0x8b8   :  { %5332 = vmatpush3.bf16.msra.mxu1 %v5727_v5  ;;  %5311 = vmatprep.subr.bf16.mxu0 %v5728_v43  ;;  %v5766_v5 = vld [vmem:[%s6649_s13 + $0x318] sm:$0xff]  }
 0x8b9   :  { %5333 = vmatprep.subr.bf16.mxu1 %v5729_v15  ;;  %v5767_v43 = vld [vmem:[%s6649_s13 + $0x398] sm:$0xff]   ;;  %v5768_v15 = vld [vmem:[%s6649_s13 + $0x360] sm:$0xff]  }
 0x8bb   :  { %5312 = vmatpush3.bf16.msra.mxu0 %v5730_v34  ;;  %v5769_v34 = vld [vmem:[%s6649_s13 + $0x3e0] sm:$0xff]  }
 0x8bc   :  { %5334 = vmatpush3.bf16.msra.mxu1 %v5731_v46  ;;  %5313 = vmatprep.subr.bf16.mxu0 %v5732_v35  ;;  %v5770_v46 = vld [vmem:[%s6649_s13 + $0x320] sm:$0xff]  }
 0x8bd   :  { %5335 = vmatprep.subr.bf16.mxu1 %v5733_v36  ;;  %v5771_v35 = vld [vmem:[%s6649_s13 + $0x3a0] sm:$0xff]   ;;  %v5772_v36 = vld [vmem:[%s6649_s13 + $0x368] sm:$0xff]  }
 0x8bf   :  { %5314 = vmatpush3.bf16.msra.mxu0 %v5734_v7  ;;  %v5773_v7 = vld [vmem:[%s6649_s13 + $0x3e8] sm:$0xff]  }
 0x8c0   :  { %5336 = vmatpush3.bf16.msra.mxu1 %v5735_v45  ;;  %5315 = vmatprep.subr.bf16.mxu0 %v5736_v8  ;;  %v5774_v45 = vld [vmem:[%s6649_s13 + $0x328] sm:$0xff]   ;;  %v2365_v8 = vrot.slane %v6443_v44, %v6204_v63  ;;  %v5782_v63 = vld [vmem:[%s6649_s13 + $0x338] sm:$0xff]  }
 0x8c1   :  { %5337 = vmatprep.subr.bf16.mxu1 %v5737_v48  ;;  %v5775_v48 = vld [vmem:[%s6649_s13 + $0x3a8] sm:$0xff]  }
 0x8c3   :  { %5316 = vmatpush3.bf16.msra.mxu0 %v5738_v53  ;;  %v5776_v53 = vld [vmem:[%s6649_s13 + $0x370] sm:$0xff]  }
 0x8c4   :  { %5338 = vmatpush3.bf16.msra.mxu1 %v5739_v54  ;;  %5317 = vmatprep.subr.bf16.mxu0 %v5740_v28  ;;  %v5777_v54 = vld [vmem:[%s6649_s13 + $0x3f0] sm:$0xff]  }
 0x8c5   :  { %5339 = vmatprep.subr.bf16.mxu1 %v5741_v55  ;;  %v5778_v28 = vld [vmem:[%s6649_s13 + $0x330] sm:$0xff]   ;;  %v2758_v55 = vadd.f32 %v6451_v47, %v2365_v8  ;;  %v2835_v47 = vpack.c.bf16 %v2819_v3, %v2819_v3  ;;  %v4219_v3 = vld [vmem:[%s6652_s25 + $0x8] sm:$0xff] }
 0x8c7   :  { %5318 = vmatpush3.bf16.msra.mxu0 %v5742_v56  ;;  %v5779_v56 = vld [vmem:[%s6649_s13 + $0x3b0] sm:$0xff]   ;;  %v2817_v44 = vmax.f32 %v2758_v55, 0.0 }
 0x8c8   :  { %5340 = vmatpush3.bf16.msra.mxu1 %v5743_v61  ;;  %5319 = vmatprep.subr.bf16.mxu0 %v5744_v1  ;;  %v5781_v61 = vld [vmem:[%s6649_s13 + $0x3f8] sm:$0xff]  }
 0x8c9   :  { %5341 = vmatprep.subr.bf16.mxu1 %v5745_v9  ;;  %v5783_v1 = vld [vmem:[%s6649_s13 + $0x3b8] sm:$0xff]   ;;  %v2833_v9 = vpack.c.bf16 %v2817_v44, %v2817_v44 }
 0x8cb   :  { %5320 = vmatpush3.bf16.msra.mxu0 %v5746_v11  ;;  %v4895_v11 = vld [vmem:[%s6651_s21] ss:$0 sm:$0xff] }
 0x8cc   :  { %5342 = vmatpush3.bf16.msra.mxu1 %v5747_v26  ;;  %5321 = vmatprep.subr.bf16.mxu0 %v5748_v39 }
 0x8cd   :  { %5343 = vmatprep.subr.bf16.mxu1 %v5749_v13 }
 0x8cf   :  { %5322 = vmatpush3.bf16.msra.mxu0 %v5750_v16 }
 0x8d0   :  { %5344 = vmatpush3.bf16.msra.mxu1 %v5751_v27  ;;  %5351 = vmatprep.subr.bf16.mxu0 %v5752_v18 }
 0x8d1   :  { %5373 = vmatprep.subr.bf16.mxu1 %v5753_v29 }
 0x8d2   :  { %4061 = vmatmul.mubr.bf16.vlgmr.msra.gmra.mrb[60].mxu0 %v2829_v21 }
 0x8d3   :  { %4101 = vmatmul.mubr.bf16.vlgmr.msra.gmra.mrb[60].mxu1 %v2831_v62  ;;  %5352 = vmatpush3.bf16.msra.mxu0 %v5754_v50 }
 0x8d4   :  { %4140 = vmatprep.mubr.bf16.mxu0 %v2834_v22  ;;  %5374 = vmatpush3.bf16.msra.mxu1 %v5755_v51 }
 0x8d5   :  { %4180 = vmatprep.mubr.bf16.mxu1 %v2836_v23  ;;  %5353 = vmatprep.subr.bf16.mxu0 %v5756_v0 }
 0x8d6   :  { %5375 = vmatprep.subr.bf16.mxu1 %v5757_v40 }
 0x8d7   :  { %5354 = vmatpush3.bf16.msra.mxu0 %v5758_v24 }
 0x8d8   :  { %5376 = vmatpush3.bf16.msra.mxu1 %v5759_v57  ;;  %5355 = vmatprep.subr.bf16.mxu0 %v5760_v25 }
 0x8d9   :  { %5377 = vmatprep.subr.bf16.mxu1 %v5761_v30 }
 0x8db   :  { %5356 = vmatpush3.bf16.msra.mxu0 %v5762_v31 }
 0x8dc   :  { %5378 = vmatpush3.bf16.msra.mxu1 %v5763_v32  ;;  %5357 = vmatprep.subr.bf16.mxu0 %v5764_v33 }
 0x8dd   :  { %5379 = vmatprep.subr.bf16.mxu1 %v5765_v14 }
 0x8df   :  { %5358 = vmatpush3.bf16.msra.mxu0 %v5766_v5 }
 0x8e0   :  { %5380 = vmatpush3.bf16.msra.mxu1 %v5767_v43  ;;  %5359 = vmatprep.subr.bf16.mxu0 %v5768_v15 }
 0x8e1   :  { %5381 = vmatprep.subr.bf16.mxu1 %v5769_v34 }
 0x8e3   :  { %5360 = vmatpush3.bf16.msra.mxu0 %v5770_v46 }
 0x8e4   :  { %5382 = vmatpush3.bf16.msra.mxu1 %v5771_v35  ;;  %5361 = vmatprep.subr.bf16.mxu0 %v5772_v36 }
 0x8e5   :  { %5383 = vmatprep.subr.bf16.mxu1 %v5773_v7 }
 0x8e7   :  { %5362 = vmatpush3.bf16.msra.mxu0 %v5774_v45 }
 0x8e8   :  { %5384 = vmatpush3.bf16.msra.mxu1 %v5775_v48  ;;  %5363 = vmatprep.subr.bf16.mxu0 %v5776_v53 }
 0x8e9   :  { %5385 = vmatprep.subr.bf16.mxu1 %v5777_v54 }
 0x8eb   :  { %5364 = vmatpush3.bf16.msra.mxu0 %v5778_v28 }
 0x8ec   :  { %5386 = vmatpush3.bf16.msra.mxu1 %v5779_v56  ;;  %5365 = vmatprep.subr.bf16.mxu0 %v5780_v60 }
 0x8ed   :  { %5387 = vmatprep.subr.bf16.mxu1 %v5781_v61 }
 0x8ef   :  { %5366 = vmatpush3.bf16.msra.mxu0 %v5782_v63 }
 0x8f0   :  { %5388 = vmatpush3.bf16.msra.mxu1 %v5783_v1 }
 0x8f2   :  { %4141 = vmatmul.mubr.bf16.vlgmr.msra.gmra.mrb[64].mxu0 %v2833_v9  ;;  %v4221_v9 = vld [vmem:[%s6652_s25 + $0x18] sm:$0xff] }
 0x8f3   :  { %4181 = vmatmul.mubr.bf16.vlgmr.msra.gmra.mrb[64].mxu1 %v2835_v47  ;;  %4301 = vmatprep.mubr.f32.mxu0 %v5881_v6  ;;  %v4218_v47 = vld [vmem:[%s6652_s25] sm:$0xff] }
 0x8f4   :  { %4424 = vmatprep.mubr.f32.mxu1 %v5881_v6 }
 0x965   :  { %v5235_v37 = vpop.f32.mrb[52].mxu0  ;;  %v5257_v10 = vpop.f32.mrb[52].mxu1 }
 0x966   :  { %v5236_v52 = vpop.f32.mrb[53].mxu0  ;;  %v5258_v26 = vpop.f32.mrb[53].mxu1 }
 0x967   :  { %v5237_v39 = vadd.f32 %v5236_v52, %v5235_v37  ;;  %v5259_v12 = vadd.f32 %v5258_v26, %v5257_v10  ;;  %v5238_v13 = vpop.f32.mrb[54].mxu0  ;;  %v5260_v49 = vpop.f32.mrb[54].mxu1  ;;  %v5453_v37 = vpack.c.bf16 %v4221_v9, %v4219_v3  ;;  %v4220_v10 = vld [vmem:[%s6652_s25 + $0x10] sm:$0xff] }
 0x968   :  { %v5239_v58 = vpop.f32.mrb[55].mxu0  ;;  %v5261_v59 = vpop.f32.mrb[55].mxu1  ;;  %v5025_v49 = vld [vmem:[%s6654_s3] ss:$0 sm:$0xff] }
 0x969   :  { %v3903_v16 = vadd.f32 %v5237_v39, %v4895_v11  ;;  %v5455_v11 = vpack.c.bf16 %v4220_v10, %v4218_v47  ;;  %5454 = vmatprep.subr.bf16.mxu0 %v5453_v37 }
 0x96b   :  { %v3943_v17 = vadd.f32 %v5259_v12, %v3903_v16  ;;  %5456 = vmatpush1.bf16.msra.mxu0 %v5455_v11  ;;  %v5024_v12 = vld [vmem:[%s6653_s29] ss:$0 sm:$0xff]  ;;  %v4329_v16 = vld [vmem:[%s6655_s8 + $0x8] sm:$0xff] }
 0x96c   :  { %5473 = vmatprep.subr.bf16.mxu0 %v5879_v4 }
 0x985   :  { %v5279_v27 = vpop.f32.mrb[56].mxu0  ;;  %v5301_v18 = vpop.f32.mrb[56].mxu1 }
 0x986   :  { %v5280_v42 = vpop.f32.mrb[57].mxu0  ;;  %v5302_v29 = vpop.f32.mrb[57].mxu1 }
 0x987   :  { %v5281_v19 = vadd.f32 %v5280_v42, %v5279_v27  ;;  %v5303_v20 = vadd.f32 %v5302_v29, %v5301_v18  ;;  %v5282_v50 = vpop.f32.mrb[58].mxu0  ;;  %v5304_v21 = vpop.f32.mrb[58].mxu1  ;;  %v4222_v18 = vld [vmem:[%s6656_s14] sm:$0x3] }
 0x988   :  { %v5283_v51 = vpop.f32.mrb[59].mxu0  ;;  %v5305_v62 = vpop.f32.mrb[59].mxu1  ;;  %v4227_v42 = vrot.slane %v4222_v18, %v6137_v38 }
 0x989   :  { %v3983_v0 = vadd.f32 %v5281_v19, %v3943_v17  ;;  %v4331_v17 = vld [vmem:[%s6655_s8 + $0x18] sm:$0xff]  ;;  %v4328_v19 = vld [vmem:[%s6655_s8] sm:$0xff]  ;;  %v4333_v62 = vld [vmem:[%s6655_s8 + $0x28] sm:$0xff] }
 0x98a   :  { %v5457_v27 = vpack.c.bf16 %v4331_v17, %v4329_v16  ;;  %v4460_v16 = vld [vmem:[%s6658_s30 + $0x20] sm:$0xff]  ;;  %v4461_v17 = vld [vmem:[%s6658_s30 + $0x28] sm:$0xff] }
 0x98b   :  { %v4023_v22 = vadd.f32 %v5303_v20, %v3983_v0  ;;  %v4330_v20 = vld [vmem:[%s6655_s8 + $0x10] sm:$0xff]  ;;  %v4335_v0 = vld [vmem:[%s6655_s8 + $0x38] sm:$0xff] }
 0x98c   :  { %5458 = vmatprep.subr.bf16.mxu1 %v5457_v27  ;;  %v5459_v51 = vpack.c.bf16 %v4330_v20, %v4328_v19  ;;  %v5480_v27 = vpack.c.bf16 %v4461_v17, %v4460_v16 }
 0x98e   :  { %5460 = vmatpush1.bf16.msra.mxu1 %v5459_v51 }
 0x9a5   :  { %v5323_v40 = vpop.f32.mrb[60].mxu0 }
 0x9a6   :  { %v5345_v23 = vpop.f32.mrb[60].mxu1  ;;  %v5324_v24 = vpop.f32.mrb[61].mxu0 }
 0x9a7   :  { %v5325_v57 = vadd.f32 %v5324_v24, %v5323_v40  ;;  %v5346_v25 = vpop.f32.mrb[61].mxu1  ;;  %v5326_v30 = vpop.f32.mrb[62].mxu0  ;;  %v5461_v40 = vpack.c.bf16 %v4335_v0, %v4333_v62  ;;  %v4337_v24 = vld [vmem:[%s6655_s8 + $0x48] sm:$0xff] }
 0x9a8   :  { %v5347_v31 = vadd.f32 %v5346_v25, %v5345_v23  ;;  %v5348_v32 = vpop.f32.mrb[62].mxu1  ;;  %v5327_v33 = vpop.f32.mrb[63].mxu0  ;;  %v4334_v23 = vld [vmem:[%s6655_s8 + $0x30] sm:$0xff] }
 0x9a9   :  { %v4063_v14 = vadd.f32 %v5325_v57, %v4023_v22  ;;  %v5349_v5 = vpop.f32.mrb[63].mxu1  ;;  %v4332_v22 = vld [vmem:[%s6655_s8 + $0x20] sm:$0xff]  ;;  %v4339_v57 = vld [vmem:[%s6655_s8 + $0x58] sm:$0xff]  ;;  %v4338_v32 = vld [vmem:[%s6655_s8 + $0x50] sm:$0xff]  ;;  %5462 = vmatprep.subr.bf16.mxu1 %v5461_v40 }
 0x9aa   :  { %v5463_v25 = vpack.c.bf16 %v4334_v23, %v4332_v22  ;;  %v5465_v30 = vpack.c.bf16 %v4339_v57, %v4337_v24  ;;  %v4341_v33 = vld [vmem:[%s6655_s8 + $0x68] sm:$0xff]  ;;  %v5032_v23 = vld [vmem:[%s6659_s22] ss:$0 sm:$0xff] }
 0x9ab   :  { %v4103_v43 = vadd.f32 %v5347_v31, %v4063_v14  ;;  %v4336_v31 = vld [vmem:[%s6655_s8 + $0x40] sm:$0xff]  ;;  %v4343_v14 = vld [vmem:[%s6655_s8 + $0x78] sm:$0xff] }
 0x9ac   :  { %5464 = vmatpush1.bf16.msra.mxu1 %v5463_v25  ;;  %v5467_v5 = vpack.c.bf16 %v4338_v32, %v4336_v31 }
 0x9ad   :  { %5466 = vmatprep.subr.bf16.mxu1 %v5465_v30 }
 0x9b0   :  { %5468 = vmatpush1.bf16.msra.mxu1 %v5467_v5 }
 0x9c5   :  { %v5367_v15 = vpop.f32.mrb[64].mxu0 }
 0x9c6   :  { %v5389_v34 = vpop.f32.mrb[64].mxu1  ;;  %v5368_v46 = vpop.f32.mrb[65].mxu0 }
 0x9c7   :  { %v5369_v35 = vadd.f32 %v5368_v46, %v5367_v15  ;;  %v5390_v36 = vpop.f32.mrb[65].mxu1  ;;  %v5370_v7 = vpop.f32.mrb[66].mxu0  ;;  %v4340_v15 = vld [vmem:[%s6655_s8 + $0x60] sm:$0xff] }
 0x9c8   :  { %v5391_v45 = vadd.f32 %v5390_v36, %v5389_v34  ;;  %v5392_v8 = vpop.f32.mrb[66].mxu1  ;;  %v5371_v48 = vpop.f32.mrb[67].mxu0  ;;  %v4342_v34 = vld [vmem:[%s6655_s8 + $0x70] sm:$0xff]  ;;  %v4231_v7 = vrot.slane %v4222_v18, %v6146_v41 }
 0x9c9   :  { %v4143_v53 = vadd.f32 %v5369_v35, %v4103_v43  ;;  %v5393_v54 = vpop.f32.mrb[67].mxu1  ;;  %v5469_v43 = vpack.c.bf16 %v4343_v14, %v4341_v33  ;;  %v5471_v46 = vpack.c.bf16 %v4342_v34, %v4340_v15  ;;  %v4573_v15 = vld [vmem:[%s6036_s27] sm:$0xff]  ;;  %v4574_v34 = vld [vmem:[%s6036_s27 + $0x8] sm:$0xff] }
 0x9cb   :  { %v4183_v28 = vadd.f32 %v5391_v45, %v4143_v53  ;;  %5470 = vmatprep.subr.bf16.mxu1 %v5469_v43 }
 0x9cc   :  { %5472 = vmatpush1.bf16.msra.mxu1 %v5471_v46  ;;  %v4575_v46 = vld [vmem:[%s6036_s27 + $0x10] sm:$0xff] }
 0x9cd   :  { %v4188_v55 = vadd.f32 %v4183_v28, %v6344_v2  ;;  %5482 = vmatprep.subr.bf16.mxu1 %v5879_v4 }
 0x9cf   :  { %v4191_v56 = vsel %vm151_vm1, %v4188_v55, 0.0 }
 0x9d0   :  { %4192 = vadd.xlane.f32.xlu0 %v4191_v56 }
 0xa5d   :  { %v4193_v60 = vpop.xlane.xlu0 %4192 }
 0xa5e   :  { %v4194_v61 = vmul.f32 0.0625, %v4193_v60 }
 0xa60   :  { %v4195_v63 = vsub.f32 %v4188_v55, %v4194_v61 }
 0xa62   :  { %v4196_v44 = vmul.f32 %v4195_v63, %v4195_v63 }
 0xa64   :  { %v4197_v1 = vsel %vm151_vm1, %v4196_v44, 0.0 }
 0xa65   :  { %4198 = vadd.xlane.f32.xlu1 %v4197_v1  ;;  %v4344_v1 = vld [vmem:[%s6657_s24] sm:$0x3] }
 0xa66   :  { %v4349_v3 = vrot.slane %v4344_v1, %v6137_v38 }
 0xaf2   :  { %v4199_v2 = vpop.xlane.xlu1 %4198 }
 0xaf3   :  { %v4200_v52 = vmul.f32 0.0625, %v4199_v2 }
 0xaf5   :  { %v4201_v26 = vadd.f32 1e-05, %v4200_v52 }
 0xaf7   :  { %5790 = vrsqrt.f32 %v4201_v26 }
 0xb01   :  { %v5791_v39 = vpop.eup %5790 }
 0xb02   :  { %v4203_v13 = vmul.f32 %v5791_v39, %v4195_v63  ;;  %v4456_v39 = vld [vmem:[%s6658_s30] sm:$0xff] }
 0xb04   :  { %v4210_v58 = vmul.f32 %v5024_v12, %v4203_v13  ;;  %v4457_v12 = vld [vmem:[%s6658_s30 + $0x8] sm:$0xff]  ;;  %v4458_v13 = vld [vmem:[%s6658_s30 + $0x10] sm:$0xff] }
 0xb06   :  { %v4217_v59 = vadd.f32 %v5025_v49, %v4210_v58  ;;  %v5474_v49 = vpack.c.bf16 %v4457_v12, %v4456_v39  ;;  %v4459_v58 = vld [vmem:[%s6658_s30 + $0x18] sm:$0xff] }
 0xb08   :  { %5026 = vmatmul.mubr.msk.f32.vlgmr.msra.gmra.mrb[2].mxu0 %vm151_vm1, %v4217_v59  ;;  %v5477_v59 = vpack.c.bf16 %v4459_v58, %v4458_v13 }
 0xb09   :  { %5433 = vmatprep.mubr.msk.f32.mxu0 %vm5880_vm0, %v5881_v6  ;;  %5475 = vmatpush3.bf16.msra.mxu0 %v5474_v49 }
 0xb0a   :  { %5476 = vmatprep.subr.bf16.mxu0 %v5879_v4 }
 0xb0d   :  { %5478 = vmatpush3.bf16.msra.mxu0 %v5477_v59 }
 0xb0e   :  { %5479 = vmatprep.subr.bf16.mxu0 %v5879_v4 }
 0xb11   :  { %5481 = vmatpush3.bf16.msra.mxu0 %v5480_v27 }
 0xbdb   :  { %v4303_v29 = vpop.f32.mrb[2].mxu0 }
 0xbdc   :  { %v4304_v50 = vadd.f32 %v4303_v29, %v4227_v42  ;;  %v4305_v21 = vpop.f32.mrb[3].mxu0  ;;  %v4353_v42 = vrot.slane %v4344_v1, %v6146_v41 }
 0xbdd   :  { %v4306_v45 = vadd.f32 %v4305_v21, %v4231_v7 }
 0xbde   :  { %5792 = vtanh.f32 %v4304_v50  ;;  %v5027_v36 = vmul.f32 -1.442695, %v4304_v50 }
 0xbdf   :  { %v5028_v8 = vmul.f32 -1.442695, %v4306_v45 }
 0xbe0   :  { %5794 = vpow2.f32 %v5027_v36  ;;  %v4576_v36 = vld [vmem:[%s6036_s27 + $0x18] sm:$0xff]  ;;  %s5824_s27 = scalar_lea.vmem %s4667_s28, 128 }
 0xbe1   :  { %5796 = vpow2.f32 %v5028_v8  ;;  %v5486_v7 = vpack.c.bf16 %v4576_v36, %v4575_v46  ;;  %p5825_p0 = scmp.ne.s32.totalorder %s4667_s28, %s5824_s27  ;;  %p5830_p2 = scmp.lt.s32.totalorder %s5824_s27, %s5824_s27 }
 0xbe3   :  { %p5831_p3 = por %p5830_p2, %p5829_p1 }
 0xbe5   :  { %p5832_p4 = pnand %p5831_p3, %p5825_p0 }
 0xbe8   :  { %v5793_v35 = vpop.eup %5792 }
 0xbe9   :  { %4322 = vrot.lane.b32.xlu0 %v5793_v35, %s5883_s19  ;;  %v5483_v35 = vpack.c.bf16 %v4574_v34, %v4573_v15 }
 0xbea   :  { %v5795_v48 = vpop.eup %5794 }
 0xbeb   :  { %v4311_v53 = vadd.f32 1.0, %v5795_v48  ;;  %v5797_v54 = vpop.eup %5796 }
 0xbec   :  { %v4318_v28 = vadd.f32 1.0, %v5797_v54 }
 0xbed   :  { %5798 = vrcp.f32 %v4311_v53 }
 0xbee   :  { %5800 = vrcp.f32 %v4318_v28 }
 0xbf7   :  { %v5799_v55 = vpop.eup %5798 }
 0xbf8   :  { %v5801_v61 = vpop.eup %5800 }
 0xc5b   :  { %v4323_v56 = vpop.permute.xlu0 %4322 }
 0xc5c   :  { %v4325_v60 = vmul.f32 %v5799_v55, %v4323_v56 }
 0xc5e   :  { %5802 = vtanh.f32 %v4325_v60 }
 0xc68   :  { %v5803_v63 = vpop.eup %5802 }
 0xc69   :  { %v4327_v44 = vmul.f32 %v5803_v63, %v5801_v61 }
 0xc6b   :  { %5029 = vmatmul.mubr.msk.f32.vlgmr.msra.gmra.mrb[34].mxu1 %vm4356_vm2, %v4327_v44 }
 0xc6c   :  { %5444 = vmatprep.mubr.msk.f32.mxu1 %vm5880_vm0, %v5881_v6  ;;  %5484 = vmatpush3.bf16.msra.mxu1 %v5483_v35 }
 0xc6d   :  { %5485 = vmatprep.subr.bf16.mxu1 %v5879_v4 }
 0xc70   :  { %5487 = vmatpush3.bf16.msra.mxu1 %v5486_v7 }
 0xd3e   :  { %v4426_v9 = vpop.f32.mrb[34].mxu1 }
 0xd3f   :  { %v4427_v47 = vadd.f32 %v4426_v9, %v4349_v3  ;;  %v4428_v37 = vpop.f32.mrb[35].mxu1 }
 0xd40   :  { %v4429_v29 = vadd.f32 %v4428_v37, %v4353_v42 }
 0xd41   :  { %5804 = vtanh.f32 %v4427_v47  ;;  %v5030_v11 = vmul.f32 -1.442695, %v4427_v47 }
 0xd42   :  { %v5031_v19 = vmul.f32 -1.442695, %v4429_v29 }
 0xd43   :  { %5806 = vpow2.f32 %v5030_v11 }
 0xd4b   :  { %v5805_v10 = vpop.eup %5804 }
 0xd4c   :  { %4445 = vrot.lane.b32.xlu1 %v5805_v10, %s5884_s6 }
 0xd4d   :  { %v5807_v2 = vpop.eup %5806 }
 0xd4e   :  { %v4434_v6 = vadd.f32 1.0, %v5807_v2 }
 0xd50   :  { %5808 = vrcp.f32 %v4434_v6 }
 0xd5a   :  { %v5809_v52 = vpop.eup %5808 }
 0xdbe   :  { %v4446_v38 = vpop.permute.xlu1 %4445 }
 0xdbf   :  { %v4448_v26 = vmul.f32 %v5809_v52, %v4446_v38 }
 0xdc1   :  { %5810 = vtanh.f32 %v4448_v26 }
 0xdc2   :  { %5812 = vpow2.f32 %v5031_v19 }
 0xdcb   :  { %v5811_v18 = vpop.eup %5810 }
 0xdcc   :  { %4451 = vrot.lane.b32.xlu1 %v5811_v18, %s5885_s4  ;;  %v5813_v20 = vpop.eup %5812 }
 0xdcd   :  { %v4441_v50 = vadd.f32 1.0, %v5813_v20 }
 0xdcf   :  { %5814 = vrcp.f32 %v4441_v50 }
 0xdd9   :  { %v5815_v21 = vpop.eup %5814 }
 0xe3e   :  { %v4452_v51 = vpop.permute.xlu1 %4451 }
 0xe3f   :  { %v4454_v62 = vmul.f32 %v5809_v52, %v4452_v51  ;;  %v4455_v0 = vmul.f32 %v5815_v21, %v4452_v51 }
 0xe41   :  { %4473 = vrot.lane.b32.xlu0 %v4455_v0, %s5886_s23  ;;  %4471 = vrot.lane.b32.xlu1 %v4454_v62, %s5886_s23 }
 0xeb3   :  { %v4474_v22 = vpop.permute.xlu0 %4473  ;;  %v4472_v40 = vpop.permute.xlu1 %4471 }
 0xeb4   :  { %v4476_v41 = vsel %vm4475_vm3, %v4472_v40, %v4474_v22 }
 0xeb5   :  { %5434 = vmatmul.mubr.msk.f32.vlgmr.msra.gmra.mrb[68].mxu0 %vm4477_vm4, %v4476_v41 }
 0xf88   :  { %v4546_v24 = vpop.f32.mrb[68].mxu0 }
 0xf89   :  { %v4547_v57 = vadd.f32 %v5032_v23, %v4546_v24  ;;  %v5435_v25 = vpop.f32.mrb[69].mxu0 }
 0xf8b   :  { %5816 = vtanh.f32 %v4547_v57  ;;  %v5034_v31 = vmul.f32 -1.442695, %v4547_v57 }
 0xf8d   :  { %5818 = vpow2.f32 %v5034_v31 }
 0xf95   :  { %v5817_v30 = vpop.eup %5816 }
 0xf96   :  { %4558 = vrot.lane.b32.xlu1 %v5817_v30, %s5885_s4 }
 0xf97   :  { %v5819_v32 = vpop.eup %5818 }
 0xf98   :  { %v4553_v33 = vadd.f32 1.0, %v5819_v32 }
 0xf9a   :  { %5820 = vrcp.f32 %v4553_v33 }
 0xfa4   :  { %v5821_v14 = vpop.eup %5820 }
0x1008   :  { %v4559_v5 = vpop.permute.xlu1 %4558 }
0x1009   :  { %v4561_v43 = vmul.f32 %v5821_v14, %v4559_v5 }
0x100b   :  { %5822 = vtanh.f32 %v4561_v43 }
0x1015   :  { %v5823_v45 = vpop.eup %5822 }
0x1016   :  { %4564 = vrot.lane.b32.xlu0 %v5823_v45, %s5883_s19 }
0x1088   :  { %v4565_v8 = vpop.permute.xlu0 %4564 }
0x1089   :  { %v4567_v48 = vmul.f32 %v5821_v14, %v4565_v8 }
0x108b   :  { %4569 = vrot.lane.b32.xlu1 %v4567_v48, %s5883_s19 }
0x10fd   :  { %v4570_v53 = vpop.permute.xlu1 %4569 }
0x10fe   :  { %4572 = vst.msk [vmem:[#allocation3] sm:$0xff] %vm4475_vm3, %v4570_v53  ;;  %5445 = vmatmul.mubr.msk.f32.vlgmr.msra.gmra.mrb[68].mxu1 %vm4475_vm3, %v4570_v53 }
0x10ff   :  { %5835 = shalt.err (!%p5832_p4)
}
0x1100   :  { %s5836_s1 = scalar_lea.hbm %s6049_s20, 128 }
0x1101   :  { %p5837_p5 = scmp.ne.s32.totalorder %s6049_s20, %s5836_s1  ;;  %p5840_p6 = scmp.lt.u32.totalorder %s5836_s1, %s6049_s20 }
0x1103   :  { %p5842_p7 = pnand %p5840_p6, %p5837_p5 }
0x1105   :  { %5845 = shalt.err (!%p5842_p7)
}
0x1106   :  { %4669 = dma.vmem_to_hbm [thread:$0]  %s4667_s28, 128, %s6049_s20, [#allocation4]   ;;  %v5035_v4 = vld [vmem:[#allocation2] ss:$0 sm:$0xff]  ;;  %vm4656_vm5 = vcmask 7168  }
0x11d1   :  { %v4652_v54 = vpop.f32.mrb[68].mxu1 }
0x11d2   :  { %v4653_v28 = vadd.f32 %v5035_v4, %v4652_v54  ;;  %v5446_v55 = vpop.f32.mrb[69].mxu1 }
0x11d4   :  { %4657 = vst.msk [vmem:[%s6044_s12] sm:$0xff] %vm4656_vm5, %v4653_v28 }
0x11d5   :  { %5846 = dma.done.wait [#allocation4], 128  }
0x11d6   :  { %5847 = vsyncadd [#allocation4], 4294967168 }
0x11d7   :  { %4675 = vsyncpa [#allocation4], 1 }

</bundles_post_ra>
